<compile_context>
chip_gen: v7x
topology: tpu7x:2x2x1
jax: 0.10.0
libtpu: 0.0.40
codegen_flags: <defaults>
</compile_context>

<pallas_src>
import functools

import jax
import jax.numpy as jnp
from jax import lax
from jax.experimental import pallas as pl
from jax.experimental.pallas import tpu as pltpu

N_EMBD = 384
N_HEAD = 6
HEAD_SIZE = N_EMBD // N_HEAD          # 64
BLOCK_SIZE = 128                      # max sequence length (causal mask size)
NEG_INF = -1e30                       # finite "-inf"; diagonal is never masked


def mha_kernel(x_ref, wq_ref, wk_ref, wv_ref, wproj_ref, bproj_ref, out_ref):
    """Processes `Bb` batch elements per grid step; all weights VMEM-resident."""
    f32, bf16 = jnp.float32, jnp.bfloat16
    Bb, T, C = x_ref.shape
    D = N_HEAD * HEAD_SIZE

    # Flatten batch into the M dim for the big matmuls; feed the MXU bf16.
    x = x_ref[...].reshape(Bb * T, C).astype(bf16)                 # (Bb*T, C)

    q = jnp.dot(x, wq_ref[...], preferred_element_type=f32).reshape(Bb, T, D)
    k = jnp.dot(x, wk_ref[...], preferred_element_type=f32).reshape(Bb, T, D)
    v = jnp.dot(x, wv_ref[...], preferred_element_type=f32).reshape(Bb, T, D)

    row = lax.broadcasted_iota(jnp.int32, (T, T), 0)
    col = lax.broadcasted_iota(jnp.int32, (T, T), 1)
    causal = col <= row                                            # (T, T)

    scale = HEAD_SIZE ** -0.5
    head_outs = []
    for h in range(N_HEAD):                                        # static unroll
        sl = slice(h * HEAD_SIZE, (h + 1) * HEAD_SIZE)
        qh = q[:, :, sl].astype(bf16)                              # (Bb, T, hs)
        kh = k[:, :, sl].astype(bf16)
        vh = v[:, :, sl].astype(bf16)

        # Batched q . k^T: contraction over the last dims, no transpose copy.
        s = jnp.einsum('bqd,bkd->bqk', qh, kh,
                       preferred_element_type=f32) * scale         # (Bb, T, T)
        s = jnp.where(causal, s, NEG_INF)
        m = jnp.max(s, axis=-1, keepdims=True)
        e = jnp.exp(s - m)
        p = e * pl.reciprocal(jnp.sum(e, axis=-1, keepdims=True), approx=True)
        # TODO(synk): nn.Dropout on attention weights omitted (identity in eval).
        head_outs.append(
            jnp.einsum('bqk,bkd->bqd', p.astype(bf16), vh,
                       preferred_element_type=f32))                # (Bb, T, hs)

    att = jnp.concatenate(head_outs, axis=-1)                      # (Bb, T, D)
    att = att.reshape(Bb * T, D).astype(bf16)

    out = jnp.dot(att, wproj_ref[...], preferred_element_type=f32) + bproj_ref[...]
    # TODO(synk): nn.Dropout after proj omitted (identity in eval mode).
    out_ref[...] = out.reshape(Bb, T, C)


def _choose_batch_tile(B):
    """Bb in {4,2,1}: amortize per-step overhead but keep >= 2 grid steps (v7x)."""
    for bb in (4, 2):
        if B % bb == 0 and B // bb >= 2:
            return bb
    return 1


def mha_forward(x, params, block_b=None):
    """x: (B, T, C) float32.  params: (wq, wk, wv, wproj, bproj)."""
    B, T, C = x.shape
    assert C == N_EMBD and T <= BLOCK_SIZE
    wq, wk, wv, wproj, bproj = params
    Bb = block_b if block_b is not None else _choose_batch_tile(B)
    assert B % Bb == 0

    def const_spec(shape):
        return pl.BlockSpec(shape, lambda b, _n=len(shape): (0,) * _n)

    return pl.pallas_call(
        mha_kernel,
        out_shape=jax.ShapeDtypeStruct((B, T, C), jnp.float32),
        grid_spec=pltpu.PrefetchScalarGridSpec(
            num_scalar_prefetch=0,
            grid=(B // Bb,),
            in_specs=[pl.BlockSpec((Bb, T, C), lambda b: (b, 0, 0)),
                      const_spec(wq.shape),
                      const_spec(wk.shape),
                      const_spec(wv.shape),
                      const_spec(wproj.shape),
                      const_spec(bproj.shape)],
            out_specs=pl.BlockSpec((Bb, T, C), lambda b: (b, 0, 0)),
        ),
        compiler_params=pltpu.CompilerParams(
            dimension_semantics=("parallel",),
            vmem_limit_bytes=48 * 1024 * 1024,   # fits v7x's 64 MiB physical VMEM
        ),
    )(x, wq, wk, wv, wproj, bproj)


def init_params(key):
    """PyTorch-default init (U(+-1/sqrt(fan_in))); weights stored bf16 for the MXU."""
    ks = jax.random.split(key, 4)

    def linear_t(k, fan_in, fan_out, bias=True):
        bound = 1.0 / (fan_in ** 0.5)
        kw, kb = jax.random.split(k)
        w = jax.random.uniform(kw, (fan_in, fan_out), jnp.float32, -bound, bound)
        if not bias:
            return w
        b = jax.random.uniform(kb, (1, fan_out), jnp.float32, -bound, bound)
        return w, b

    D = N_HEAD * HEAD_SIZE
    wq = linear_t(ks[0], N_EMBD, D, bias=False)      # per-head keys concatenated
    wk = linear_t(ks[1], N_EMBD, D, bias=False)
    wv = linear_t(ks[2], N_EMBD, D, bias=False)
    wproj, bproj = linear_t(ks[3], D, N_EMBD)
    bf = jnp.bfloat16
    return (wq.astype(bf), wk.astype(bf), wv.astype(bf), wproj.astype(bf), bproj)


def mha_reference(x, params):
    """Pure-JAX reference matching PyTorch eval-mode forward (f32, HIGHEST)."""
    wq, wk, wv, wproj, bproj = [p.astype(jnp.float32) for p in params]
    hp = functools.partial(jnp.einsum, precision=lax.Precision.HIGHEST)
    B, T, C = x.shape
    q = hp('btc,cd->btd', x, wq).reshape(B, T, N_HEAD, HEAD_SIZE)
    k = hp('btc,cd->btd', x, wk).reshape(B, T, N_HEAD, HEAD_SIZE)
    v = hp('btc,cd->btd', x, wv).reshape(B, T, N_HEAD, HEAD_SIZE)
    wei = hp('bqhd,bkhd->bhqk', q, k) * (HEAD_SIZE ** -0.5)
    mask = jnp.tril(jnp.ones((T, T), bool))
    wei = jnp.where(mask[None, None], wei, -jnp.inf)
    wei = jax.nn.softmax(wei, axis=-1)
    att = hp('bhqk,bkhd->bqhd', wei, v).reshape(B, T, N_HEAD * HEAD_SIZE)
    return hp('btd,dc->btc', att, wproj) + bproj


if __name__ == "__main__":
    key = jax.random.PRNGKey(0)
    k_in, k_in2, k_par = jax.random.split(key, 3)
    params = init_params(k_par)

    # Small shape (batch=2, seq=8, n_embd=384).
    B, T = 2, 8
    x = jax.random.normal(k_in, (B, T, N_EMBD), jnp.float32)
    out = jax.block_until_ready(mha_forward(x, params))
    ref = mha_reference(x, params)
    assert out.shape == (B, T, N_EMBD)
    # bf16 MXU inputs + approx reciprocal => small, bounded deviation from the
    # f32/HIGHEST reference.
    assert jnp.allclose(out, ref, atol=2e-2, rtol=2e-2), "mismatch vs JAX reference"

    # Full-size shape exercising the batch-tiled path (Bb=2, grid of 2 steps).
    B2, T2 = 4, BLOCK_SIZE
    x2 = jax.random.normal(k_in2, (B2, T2, N_EMBD), jnp.float32)
    out2 = jax.block_until_ready(mha_forward(x2, params))
    ref2 = mha_reference(x2, params)
    assert jnp.allclose(out2, ref2, atol=2e-2, rtol=2e-2), "mismatch (large) vs reference"

    print("KERNEL_OK")
</pallas_src>

<mosaic_0001>
module attributes {stable_mosaic.version = 11 : i64} {
  func.func @mha_kernel(%arg0: i32, %arg1: memref<1x8x384xf32, #tpu.memory_space<vmem>>, %arg2: memref<384x384xbf16, #tpu.memory_space<vmem>>, %arg3: memref<384x384xbf16, #tpu.memory_space<vmem>>, %arg4: memref<384x384xbf16, #tpu.memory_space<vmem>>, %arg5: memref<384x384xbf16, #tpu.memory_space<vmem>>, %arg6: memref<1x384xf32, #tpu.memory_space<vmem>>, %arg7: memref<1x8x384xf32, #tpu.memory_space<vmem>>) attributes {dimension_semantics = [#tpu.dimension_semantics<parallel>], iteration_bounds = array<i64: 2>, scalar_prefetch = 0 : i64, scratch_operands = 0 : i64, tpu.core_type = #tpu.core_type<tc>, window_params = [{transform_indices = @transform_0, window_bounds = array<i64: 1, 8, 384>}, {pipeline_mode = #tpu.pipeline_mode<synchronous>, transform_indices = @transform_1, window_bounds = array<i64: 384, 384>}, {pipeline_mode = #tpu.pipeline_mode<synchronous>, transform_indices = @transform_2, window_bounds = array<i64: 384, 384>}, {pipeline_mode = #tpu.pipeline_mode<synchronous>, transform_indices = @transform_3, window_bounds = array<i64: 384, 384>}, {pipeline_mode = #tpu.pipeline_mode<synchronous>, transform_indices = @transform_4, window_bounds = array<i64: 384, 384>}, {pipeline_mode = #tpu.pipeline_mode<synchronous>, transform_indices = @transform_5, window_bounds = array<i64: 1, 384>}, {transform_indices = @transform_6, window_bounds = array<i64: 1, 8, 384>}]} {
    %c0 = arith.constant 0 : index
    %c0_0 = arith.constant 0 : index
    %c0_1 = arith.constant 0 : index
    %0 = vector.load %arg1[%c0, %c0_0, %c0_1] : memref<1x8x384xf32, #tpu.memory_space<vmem>>, vector<1x8x384xf32>
    %1 = vector.shape_cast %0 : vector<1x8x384xf32> to vector<8x384xf32>
    %2 = arith.truncf %1 : vector<8x384xf32> to vector<8x384xbf16>
    %c0_2 = arith.constant 0 : index
    %c0_3 = arith.constant 0 : index
    %3 = vector.load %arg2[%c0_2, %c0_3] : memref<384x384xbf16, #tpu.memory_space<vmem>>, vector<384x384xbf16>
    %cst = arith.constant dense<0.000000e+00> : vector<8x384xf32>
    %4 = tpu.matmul %2, %3, %cst {dimension_numbers = #tpu.dot_dimension_numbers<[1], [0], [0], [1], [0, 0, 1, 1], [], []>} : vector<8x384xbf16>, vector<384x384xbf16>, vector<8x384xf32> -> vector<8x384xf32>
    %5 = vector.shape_cast %4 : vector<8x384xf32> to vector<1x8x384xf32>
    %c0_4 = arith.constant 0 : index
    %c0_5 = arith.constant 0 : index
    %6 = vector.load %arg3[%c0_4, %c0_5] : memref<384x384xbf16, #tpu.memory_space<vmem>>, vector<384x384xbf16>
    %cst_6 = arith.constant dense<0.000000e+00> : vector<8x384xf32>
    %7 = tpu.matmul %2, %6, %cst_6 {dimension_numbers = #tpu.dot_dimension_numbers<[1], [0], [0], [1], [0, 0, 1, 1], [], []>} : vector<8x384xbf16>, vector<384x384xbf16>, vector<8x384xf32> -> vector<8x384xf32>
    %8 = vector.shape_cast %7 : vector<8x384xf32> to vector<1x8x384xf32>
    %c0_7 = arith.constant 0 : index
    %c0_8 = arith.constant 0 : index
    %9 = vector.load %arg4[%c0_7, %c0_8] : memref<384x384xbf16, #tpu.memory_space<vmem>>, vector<384x384xbf16>
    %cst_9 = arith.constant dense<0.000000e+00> : vector<8x384xf32>
    %10 = tpu.matmul %2, %9, %cst_9 {dimension_numbers = #tpu.dot_dimension_numbers<[1], [0], [0], [1], [0, 0, 1, 1], [], []>} : vector<8x384xbf16>, vector<384x384xbf16>, vector<8x384xf32> -> vector<8x384xf32>
    %11 = vector.shape_cast %10 : vector<8x384xf32> to vector<1x8x384xf32>
    %12 = tpu.iota {dimensions = array<i32: 0>} : vector<8x8xi32>
    %13 = tpu.iota {dimensions = array<i32: 1>} : vector<8x8xi32>
    %14 = arith.cmpi sle, %13, %12 : vector<8x8xi32>
    %15 = vector.extract_strided_slice %5 {offsets = [0, 0, 0], sizes = [1, 8, 64], strides = [1, 1, 1]} : vector<1x8x384xf32> to vector<1x8x64xf32>
    %16 = arith.truncf %15 : vector<1x8x64xf32> to vector<1x8x64xbf16>
    %17 = vector.extract_strided_slice %8 {offsets = [0, 0, 0], sizes = [1, 8, 64], strides = [1, 1, 1]} : vector<1x8x384xf32> to vector<1x8x64xf32>
    %18 = arith.truncf %17 : vector<1x8x64xf32> to vector<1x8x64xbf16>
    %19 = vector.extract_strided_slice %11 {offsets = [0, 0, 0], sizes = [1, 8, 64], strides = [1, 1, 1]} : vector<1x8x384xf32> to vector<1x8x64xf32>
    %20 = arith.truncf %19 : vector<1x8x64xf32> to vector<1x8x64xbf16>
    "tpu.trace_start"() <{level = 10 : i32, message = "bqd,bkd->bqk"}> : () -> ()
    %cst_10 = arith.constant dense<0.000000e+00> : vector<1x8x8xf32>
    %21 = tpu.matmul %16, %18, %cst_10 {dimension_numbers = #tpu.dot_dimension_numbers<[2], [2], [1], [1], [0, 0, 0, 1, 1, 1], [0], [0]>} : vector<1x8x64xbf16>, vector<1x8x64xbf16>, vector<1x8x8xf32> -> vector<1x8x8xf32>
    "tpu.trace_stop"() : () -> ()
    %cst_11 = arith.constant 1.250000e-01 : f32
    %22 = vector.broadcast %cst_11 : f32 to vector<1x8x8xf32>
    %23 = arith.mulf %21, %22 : vector<1x8x8xf32>
    %cst_12 = arith.constant -1.000000e+30 : f32
    %24 = vector.shape_cast %14 : vector<8x8xi1> to vector<1x8x8xi1>
    %25 = vector.broadcast %cst_12 : f32 to vector<1x8x8xf32>
    %26 = arith.select %24, %23, %25 : vector<1x8x8xi1>, vector<1x8x8xf32>
    %cst_13 = arith.constant dense<0xFF800000> : vector<1x8xf32>
    %27 = vector.multi_reduction <maximumf>, %26, %cst_13 [2] : vector<1x8x8xf32> to vector<1x8xf32>
    %28 = vector.shape_cast %27 : vector<1x8xf32> to vector<1x8x1xf32>
    %29 = vector.broadcast %28 : vector<1x8x1xf32> to vector<1x8x8xf32>
    %30 = arith.subf %26, %29 : vector<1x8x8xf32>
    %31 = math.exp %30 : vector<1x8x8xf32>
    %cst_14 = arith.constant dense<0.000000e+00> : vector<1x8xf32>
    %32 = vector.multi_reduction <add>, %31, %cst_14 [2] : vector<1x8x8xf32> to vector<1x8xf32>
    %33 = vector.shape_cast %32 : vector<1x8xf32> to vector<1x8x1xf32>
    %34 = tpu.reciprocal %33 {approx = true} : vector<1x8x1xf32> -> vector<1x8x1xf32>
    %35 = vector.broadcast %34 : vector<1x8x1xf32> to vector<1x8x8xf32>
    %36 = arith.mulf %31, %35 : vector<1x8x8xf32>
    %37 = arith.truncf %36 : vector<1x8x8xf32> to vector<1x8x8xbf16>
    "tpu.trace_start"() <{level = 10 : i32, message = "bqk,bkd->bqd"}> : () -> ()
    %cst_15 = arith.constant dense<0.000000e+00> : vector<1x8x64xf32>
    %38 = tpu.matmul %37, %20, %cst_15 {dimension_numbers = #tpu.dot_dimension_numbers<[2], [1], [1], [2], [0, 0, 0, 1, 1, 2], [0], [0]>} : vector<1x8x8xbf16>, vector<1x8x64xbf16>, vector<1x8x64xf32> -> vector<1x8x64xf32>
    "tpu.trace_stop"() : () -> ()
    %39 = vector.extract_strided_slice %5 {offsets = [0, 0, 64], sizes = [1, 8, 64], strides = [1, 1, 1]} : vector<1x8x384xf32> to vector<1x8x64xf32>
    %40 = arith.truncf %39 : vector<1x8x64xf32> to vector<1x8x64xbf16>
    %41 = vector.extract_strided_slice %8 {offsets = [0, 0, 64], sizes = [1, 8, 64], strides = [1, 1, 1]} : vector<1x8x384xf32> to vector<1x8x64xf32>
    %42 = arith.truncf %41 : vector<1x8x64xf32> to vector<1x8x64xbf16>
    %43 = vector.extract_strided_slice %11 {offsets = [0, 0, 64], sizes = [1, 8, 64], strides = [1, 1, 1]} : vector<1x8x384xf32> to vector<1x8x64xf32>
    %44 = arith.truncf %43 : vector<1x8x64xf32> to vector<1x8x64xbf16>
    "tpu.trace_start"() <{level = 10 : i32, message = "bqd,bkd->bqk"}> : () -> ()
    %cst_16 = arith.constant dense<0.000000e+00> : vector<1x8x8xf32>
    %45 = tpu.matmul %40, %42, %cst_16 {dimension_numbers = #tpu.dot_dimension_numbers<[2], [2], [1], [1], [0, 0, 0, 1, 1, 1], [0], [0]>} : vector<1x8x64xbf16>, vector<1x8x64xbf16>, vector<1x8x8xf32> -> vector<1x8x8xf32>
    "tpu.trace_stop"() : () -> ()
    %cst_17 = arith.constant 1.250000e-01 : f32
    %46 = vector.broadcast %cst_17 : f32 to vector<1x8x8xf32>
    %47 = arith.mulf %45, %46 : vector<1x8x8xf32>
    %cst_18 = arith.constant -1.000000e+30 : f32
    %48 = vector.shape_cast %14 : vector<8x8xi1> to vector<1x8x8xi1>
    %49 = vector.broadcast %cst_18 : f32 to vector<1x8x8xf32>
    %50 = arith.select %48, %47, %49 : vector<1x8x8xi1>, vector<1x8x8xf32>
    %cst_19 = arith.constant dense<0xFF800000> : vector<1x8xf32>
    %51 = vector.multi_reduction <maximumf>, %50, %cst_19 [2] : vector<1x8x8xf32> to vector<1x8xf32>
    %52 = vector.shape_cast %51 : vector<1x8xf32> to vector<1x8x1xf32>
    %53 = vector.broadcast %52 : vector<1x8x1xf32> to vector<1x8x8xf32>
    %54 = arith.subf %50, %53 : vector<1x8x8xf32>
    %55 = math.exp %54 : vector<1x8x8xf32>
    %cst_20 = arith.constant dense<0.000000e+00> : vector<1x8xf32>
    %56 = vector.multi_reduction <add>, %55, %cst_20 [2] : vector<1x8x8xf32> to vector<1x8xf32>
    %57 = vector.shape_cast %56 : vector<1x8xf32> to vector<1x8x1xf32>
    %58 = tpu.reciprocal %57 {approx = true} : vector<1x8x1xf32> -> vector<1x8x1xf32>
    %59 = vector.broadcast %58 : vector<1x8x1xf32> to vector<1x8x8xf32>
    %60 = arith.mulf %55, %59 : vector<1x8x8xf32>
    %61 = arith.truncf %60 : vector<1x8x8xf32> to vector<1x8x8xbf16>
    "tpu.trace_start"() <{level = 10 : i32, message = "bqk,bkd->bqd"}> : () -> ()
    %cst_21 = arith.constant dense<0.000000e+00> : vector<1x8x64xf32>
    %62 = tpu.matmul %61, %44, %cst_21 {dimension_numbers = #tpu.dot_dimension_numbers<[2], [1], [1], [2], [0, 0, 0, 1, 1, 2], [0], [0]>} : vector<1x8x8xbf16>, vector<1x8x64xbf16>, vector<1x8x64xf32> -> vector<1x8x64xf32>
    "tpu.trace_stop"() : () -> ()
    %63 = vector.extract_strided_slice %5 {offsets = [0, 0, 128], sizes = [1, 8, 64], strides = [1, 1, 1]} : vector<1x8x384xf32> to vector<1x8x64xf32>
    %64 = arith.truncf %63 : vector<1x8x64xf32> to vector<1x8x64xbf16>
    %65 = vector.extract_strided_slice %8 {offsets = [0, 0, 128], sizes = [1, 8, 64], strides = [1, 1, 1]} : vector<1x8x384xf32> to vector<1x8x64xf32>
    %66 = arith.truncf %65 : vector<1x8x64xf32> to vector<1x8x64xbf16>
    %67 = vector.extract_strided_slice %11 {offsets = [0, 0, 128], sizes = [1, 8, 64], strides = [1, 1, 1]} : vector<1x8x384xf32> to vector<1x8x64xf32>
    %68 = arith.truncf %67 : vector<1x8x64xf32> to vector<1x8x64xbf16>
    "tpu.trace_start"() <{level = 10 : i32, message = "bqd,bkd->bqk"}> : () -> ()
    %cst_22 = arith.constant dense<0.000000e+00> : vector<1x8x8xf32>
    %69 = tpu.matmul %64, %66, %cst_22 {dimension_numbers = #tpu.dot_dimension_numbers<[2], [2], [1], [1], [0, 0, 0, 1, 1, 1], [0], [0]>} : vector<1x8x64xbf16>, vector<1x8x64xbf16>, vector<1x8x8xf32> -> vector<1x8x8xf32>
    "tpu.trace_stop"() : () -> ()
    %cst_23 = arith.constant 1.250000e-01 : f32
    %70 = vector.broadcast %cst_23 : f32 to vector<1x8x8xf32>
    %71 = arith.mulf %69, %70 : vector<1x8x8xf32>
    %cst_24 = arith.constant -1.000000e+30 : f32
    %72 = vector.shape_cast %14 : vector<8x8xi1> to vector<1x8x8xi1>
    %73 = vector.broadcast %cst_24 : f32 to vector<1x8x8xf32>
    %74 = arith.select %72, %71, %73 : vector<1x8x8xi1>, vector<1x8x8xf32>
    %cst_25 = arith.constant dense<0xFF800000> : vector<1x8xf32>
    %75 = vector.multi_reduction <maximumf>, %74, %cst_25 [2] : vector<1x8x8xf32> to vector<1x8xf32>
    %76 = vector.shape_cast %75 : vector<1x8xf32> to vector<1x8x1xf32>
    %77 = vector.broadcast %76 : vector<1x8x1xf32> to vector<1x8x8xf32>
    %78 = arith.subf %74, %77 : vector<1x8x8xf32>
    %79 = math.exp %78 : vector<1x8x8xf32>
    %cst_26 = arith.constant dense<0.000000e+00> : vector<1x8xf32>
    %80 = vector.multi_reduction <add>, %79, %cst_26 [2] : vector<1x8x8xf32> to vector<1x8xf32>
    %81 = vector.shape_cast %80 : vector<1x8xf32> to vector<1x8x1xf32>
    %82 = tpu.reciprocal %81 {approx = true} : vector<1x8x1xf32> -> vector<1x8x1xf32>
    %83 = vector.broadcast %82 : vector<1x8x1xf32> to vector<1x8x8xf32>
    %84 = arith.mulf %79, %83 : vector<1x8x8xf32>
    %85 = arith.truncf %84 : vector<1x8x8xf32> to vector<1x8x8xbf16>
    "tpu.trace_start"() <{level = 10 : i32, message = "bqk,bkd->bqd"}> : () -> ()
    %cst_27 = arith.constant dense<0.000000e+00> : vector<1x8x64xf32>
    %86 = tpu.matmul %85, %68, %cst_27 {dimension_numbers = #tpu.dot_dimension_numbers<[2], [1], [1], [2], [0, 0, 0, 1, 1, 2], [0], [0]>} : vector<1x8x8xbf16>, vector<1x8x64xbf16>, vector<1x8x64xf32> -> vector<1x8x64xf32>
    "tpu.trace_stop"() : () -> ()
    %87 = vector.extract_strided_slice %5 {offsets = [0, 0, 192], sizes = [1, 8, 64], strides = [1, 1, 1]} : vector<1x8x384xf32> to vector<1x8x64xf32>
    %88 = arith.truncf %87 : vector<1x8x64xf32> to vector<1x8x64xbf16>
    %89 = vector.extract_strided_slice %8 {offsets = [0, 0, 192], sizes = [1, 8, 64], strides = [1, 1, 1]} : vector<1x8x384xf32> to vector<1x8x64xf32>
    %90 = arith.truncf %89 : vector<1x8x64xf32> to vector<1x8x64xbf16>
    %91 = vector.extract_strided_slice %11 {offsets = [0, 0, 192], sizes = [1, 8, 64], strides = [1, 1, 1]} : vector<1x8x384xf32> to vector<1x8x64xf32>
    %92 = arith.truncf %91 : vector<1x8x64xf32> to vector<1x8x64xbf16>
    "tpu.trace_start"() <{level = 10 : i32, message = "bqd,bkd->bqk"}> : () -> ()
    %cst_28 = arith.constant dense<0.000000e+00> : vector<1x8x8xf32>
    %93 = tpu.matmul %88, %90, %cst_28 {dimension_numbers = #tpu.dot_dimension_numbers<[2], [2], [1], [1], [0, 0, 0, 1, 1, 1], [0], [0]>} : vector<1x8x64xbf16>, vector<1x8x64xbf16>, vector<1x8x8xf32> -> vector<1x8x8xf32>
    "tpu.trace_stop"() : () -> ()
    %cst_29 = arith.constant 1.250000e-01 : f32
    %94 = vector.broadcast %cst_29 : f32 to vector<1x8x8xf32>
    %95 = arith.mulf %93, %94 : vector<1x8x8xf32>
    %cst_30 = arith.constant -1.000000e+30 : f32
    %96 = vector.shape_cast %14 : vector<8x8xi1> to vector<1x8x8xi1>
    %97 = vector.broadcast %cst_30 : f32 to vector<1x8x8xf32>
    %98 = arith.select %96, %95, %97 : vector<1x8x8xi1>, vector<1x8x8xf32>
    %cst_31 = arith.constant dense<0xFF800000> : vector<1x8xf32>
    %99 = vector.multi_reduction <maximumf>, %98, %cst_31 [2] : vector<1x8x8xf32> to vector<1x8xf32>
    %100 = vector.shape_cast %99 : vector<1x8xf32> to vector<1x8x1xf32>
    %101 = vector.broadcast %100 : vector<1x8x1xf32> to vector<1x8x8xf32>
    %102 = arith.subf %98, %101 : vector<1x8x8xf32>
    %103 = math.exp %102 : vector<1x8x8xf32>
    %cst_32 = arith.constant dense<0.000000e+00> : vector<1x8xf32>
    %104 = vector.multi_reduction <add>, %103, %cst_32 [2] : vector<1x8x8xf32> to vector<1x8xf32>
    %105 = vector.shape_cast %104 : vector<1x8xf32> to vector<1x8x1xf32>
    %106 = tpu.reciprocal %105 {approx = true} : vector<1x8x1xf32> -> vector<1x8x1xf32>
    %107 = vector.broadcast %106 : vector<1x8x1xf32> to vector<1x8x8xf32>
    %108 = arith.mulf %103, %107 : vector<1x8x8xf32>
    %109 = arith.truncf %108 : vector<1x8x8xf32> to vector<1x8x8xbf16>
    "tpu.trace_start"() <{level = 10 : i32, message = "bqk,bkd->bqd"}> : () -> ()
    %cst_33 = arith.constant dense<0.000000e+00> : vector<1x8x64xf32>
    %110 = tpu.matmul %109, %92, %cst_33 {dimension_numbers = #tpu.dot_dimension_numbers<[2], [1], [1], [2], [0, 0, 0, 1, 1, 2], [0], [0]>} : vector<1x8x8xbf16>, vector<1x8x64xbf16>, vector<1x8x64xf32> -> vector<1x8x64xf32>
    "tpu.trace_stop"() : () -> ()
    %111 = vector.extract_strided_slice %5 {offsets = [0, 0, 256], sizes = [1, 8, 64], strides = [1, 1, 1]} : vector<1x8x384xf32> to vector<1x8x64xf32>
    %112 = arith.truncf %111 : vector<1x8x64xf32> to vector<1x8x64xbf16>
    %113 = vector.extract_strided_slice %8 {offsets = [0, 0, 256], sizes = [1, 8, 64], strides = [1, 1, 1]} : vector<1x8x384xf32> to vector<1x8x64xf32>
    %114 = arith.truncf %113 : vector<1x8x64xf32> to vector<1x8x64xbf16>
    %115 = vector.extract_strided_slice %11 {offsets = [0, 0, 256], sizes = [1, 8, 64], strides = [1, 1, 1]} : vector<1x8x384xf32> to vector<1x8x64xf32>
    %116 = arith.truncf %115 : vector<1x8x64xf32> to vector<1x8x64xbf16>
    "tpu.trace_start"() <{level = 10 : i32, message = "bqd,bkd->bqk"}> : () -> ()
    %cst_34 = arith.constant dense<0.000000e+00> : vector<1x8x8xf32>
    %117 = tpu.matmul %112, %114, %cst_34 {dimension_numbers = #tpu.dot_dimension_numbers<[2], [2], [1], [1], [0, 0, 0, 1, 1, 1], [0], [0]>} : vector<1x8x64xbf16>, vector<1x8x64xbf16>, vector<1x8x8xf32> -> vector<1x8x8xf32>
    "tpu.trace_stop"() : () -> ()
    %cst_35 = arith.constant 1.250000e-01 : f32
    %118 = vector.broadcast %cst_35 : f32 to vector<1x8x8xf32>
    %119 = arith.mulf %117, %118 : vector<1x8x8xf32>
    %cst_36 = arith.constant -1.000000e+30 : f32
    %120 = vector.shape_cast %14 : vector<8x8xi1> to vector<1x8x8xi1>
    %121 = vector.broadcast %cst_36 : f32 to vector<1x8x8xf32>
    %122 = arith.select %120, %119, %121 : vector<1x8x8xi1>, vector<1x8x8xf32>
    %cst_37 = arith.constant dense<0xFF800000> : vector<1x8xf32>
    %123 = vector.multi_reduction <maximumf>, %122, %cst_37 [2] : vector<1x8x8xf32> to vector<1x8xf32>
    %124 = vector.shape_cast %123 : vector<1x8xf32> to vector<1x8x1xf32>
    %125 = vector.broadcast %124 : vector<1x8x1xf32> to vector<1x8x8xf32>
    %126 = arith.subf %122, %125 : vector<1x8x8xf32>
    %127 = math.exp %126 : vector<1x8x8xf32>
    %cst_38 = arith.constant dense<0.000000e+00> : vector<1x8xf32>
    %128 = vector.multi_reduction <add>, %127, %cst_38 [2] : vector<1x8x8xf32> to vector<1x8xf32>
    %129 = vector.shape_cast %128 : vector<1x8xf32> to vector<1x8x1xf32>
    %130 = tpu.reciprocal %129 {approx = true} : vector<1x8x1xf32> -> vector<1x8x1xf32>
    %131 = vector.broadcast %130 : vector<1x8x1xf32> to vector<1x8x8xf32>
    %132 = arith.mulf %127, %131 : vector<1x8x8xf32>
    %133 = arith.truncf %132 : vector<1x8x8xf32> to vector<1x8x8xbf16>
    "tpu.trace_start"() <{level = 10 : i32, message = "bqk,bkd->bqd"}> : () -> ()
    %cst_39 = arith.constant dense<0.000000e+00> : vector<1x8x64xf32>
    %134 = tpu.matmul %133, %116, %cst_39 {dimension_numbers = #tpu.dot_dimension_numbers<[2], [1], [1], [2], [0, 0, 0, 1, 1, 2], [0], [0]>} : vector<1x8x8xbf16>, vector<1x8x64xbf16>, vector<1x8x64xf32> -> vector<1x8x64xf32>
    "tpu.trace_stop"() : () -> ()
    %135 = vector.extract_strided_slice %5 {offsets = [0, 0, 320], sizes = [1, 8, 64], strides = [1, 1, 1]} : vector<1x8x384xf32> to vector<1x8x64xf32>
    %136 = arith.truncf %135 : vector<1x8x64xf32> to vector<1x8x64xbf16>
    %137 = vector.extract_strided_slice %8 {offsets = [0, 0, 320], sizes = [1, 8, 64], strides = [1, 1, 1]} : vector<1x8x384xf32> to vector<1x8x64xf32>
    %138 = arith.truncf %137 : vector<1x8x64xf32> to vector<1x8x64xbf16>
    %139 = vector.extract_strided_slice %11 {offsets = [0, 0, 320], sizes = [1, 8, 64], strides = [1, 1, 1]} : vector<1x8x384xf32> to vector<1x8x64xf32>
    %140 = arith.truncf %139 : vector<1x8x64xf32> to vector<1x8x64xbf16>
    "tpu.trace_start"() <{level = 10 : i32, message = "bqd,bkd->bqk"}> : () -> ()
    %cst_40 = arith.constant dense<0.000000e+00> : vector<1x8x8xf32>
    %141 = tpu.matmul %136, %138, %cst_40 {dimension_numbers = #tpu.dot_dimension_numbers<[2], [2], [1], [1], [0, 0, 0, 1, 1, 1], [0], [0]>} : vector<1x8x64xbf16>, vector<1x8x64xbf16>, vector<1x8x8xf32> -> vector<1x8x8xf32>
    "tpu.trace_stop"() : () -> ()
    %cst_41 = arith.constant 1.250000e-01 : f32
    %142 = vector.broadcast %cst_41 : f32 to vector<1x8x8xf32>
    %143 = arith.mulf %141, %142 : vector<1x8x8xf32>
    %cst_42 = arith.constant -1.000000e+30 : f32
    %144 = vector.shape_cast %14 : vector<8x8xi1> to vector<1x8x8xi1>
    %145 = vector.broadcast %cst_42 : f32 to vector<1x8x8xf32>
    %146 = arith.select %144, %143, %145 : vector<1x8x8xi1>, vector<1x8x8xf32>
    %cst_43 = arith.constant dense<0xFF800000> : vector<1x8xf32>
    %147 = vector.multi_reduction <maximumf>, %146, %cst_43 [2] : vector<1x8x8xf32> to vector<1x8xf32>
    %148 = vector.shape_cast %147 : vector<1x8xf32> to vector<1x8x1xf32>
    %149 = vector.broadcast %148 : vector<1x8x1xf32> to vector<1x8x8xf32>
    %150 = arith.subf %146, %149 : vector<1x8x8xf32>
    %151 = math.exp %150 : vector<1x8x8xf32>
    %cst_44 = arith.constant dense<0.000000e+00> : vector<1x8xf32>
    %152 = vector.multi_reduction <add>, %151, %cst_44 [2] : vector<1x8x8xf32> to vector<1x8xf32>
    %153 = vector.shape_cast %152 : vector<1x8xf32> to vector<1x8x1xf32>
    %154 = tpu.reciprocal %153 {approx = true} : vector<1x8x1xf32> -> vector<1x8x1xf32>
    %155 = vector.broadcast %154 : vector<1x8x1xf32> to vector<1x8x8xf32>
    %156 = arith.mulf %151, %155 : vector<1x8x8xf32>
    %157 = arith.truncf %156 : vector<1x8x8xf32> to vector<1x8x8xbf16>
    "tpu.trace_start"() <{level = 10 : i32, message = "bqk,bkd->bqd"}> : () -> ()
    %cst_45 = arith.constant dense<0.000000e+00> : vector<1x8x64xf32>
    %158 = tpu.matmul %157, %140, %cst_45 {dimension_numbers = #tpu.dot_dimension_numbers<[2], [1], [1], [2], [0, 0, 0, 1, 1, 2], [0], [0]>} : vector<1x8x8xbf16>, vector<1x8x64xbf16>, vector<1x8x64xf32> -> vector<1x8x64xf32>
    "tpu.trace_stop"() : () -> ()
    %159 = tpu.concatenate %38, %62, %86, %110, %134, %158 in 2 : vector<1x8x64xf32>, vector<1x8x64xf32>, vector<1x8x64xf32>, vector<1x8x64xf32>, vector<1x8x64xf32>, vector<1x8x64xf32> -> vector<1x8x384xf32>
    %160 = vector.shape_cast %159 : vector<1x8x384xf32> to vector<8x384xf32>
    %161 = arith.truncf %160 : vector<8x384xf32> to vector<8x384xbf16>
    %c0_46 = arith.constant 0 : index
    %c0_47 = arith.constant 0 : index
    %162 = vector.load %arg5[%c0_46, %c0_47] : memref<384x384xbf16, #tpu.memory_space<vmem>>, vector<384x384xbf16>
    %cst_48 = arith.constant dense<0.000000e+00> : vector<8x384xf32>
    %163 = tpu.matmul %161, %162, %cst_48 {dimension_numbers = #tpu.dot_dimension_numbers<[1], [0], [0], [1], [0, 0, 1, 1], [], []>} : vector<8x384xbf16>, vector<384x384xbf16>, vector<8x384xf32> -> vector<8x384xf32>
    %c0_49 = arith.constant 0 : index
    %c0_50 = arith.constant 0 : index
    %164 = vector.load %arg6[%c0_49, %c0_50] : memref<1x384xf32, #tpu.memory_space<vmem>>, vector<1x384xf32>
    %165 = vector.broadcast %164 : vector<1x384xf32> to vector<8x384xf32>
    %166 = arith.addf %163, %165 : vector<8x384xf32>
    %167 = vector.shape_cast %166 : vector<8x384xf32> to vector<1x8x384xf32>
    %c0_51 = arith.constant 0 : index
    %c0_52 = arith.constant 0 : index
    %c0_53 = arith.constant 0 : index
    %168 = vector.load %arg7[%c0_51, %c0_52, %c0_53] : memref<1x8x384xf32, #tpu.memory_space<vmem>>, vector<1x8x384xf32>
    tpu.vector_store %arg7[%c0_51, %c0_52, %c0_53], %167 {strides = array<i32>} : memref<1x8x384xf32, #tpu.memory_space<vmem>>, vector<1x8x384xf32>,
    return
  }
  func.func @transform_0(%arg0: i32) -> (i32, i32, i32) {
    %c0_i32 = arith.constant 0 : i32
    %c0_i32_0 = arith.constant 0 : i32
    %c0_i32_1 = arith.constant 0 : i32
    return %arg0, %c0_i32, %c0_i32_0 : i32, i32, i32
  }
  func.func @transform_1(%arg0: i32) -> (i32, i32) {
    %c0_i32 = arith.constant 0 : i32
    %c0_i32_0 = arith.constant 0 : i32
    %c0_i32_1 = arith.constant 0 : i32
    return %c0_i32, %c0_i32_0 : i32, i32
  }
  func.func @transform_2(%arg0: i32) -> (i32, i32) {
    %c0_i32 = arith.constant 0 : i32
    %c0_i32_0 = arith.constant 0 : i32
    %c0_i32_1 = arith.constant 0 : i32
    return %c0_i32, %c0_i32_0 : i32, i32
  }
  func.func @transform_3(%arg0: i32) -> (i32, i32) {
    %c0_i32 = arith.constant 0 : i32
    %c0_i32_0 = arith.constant 0 : i32
    %c0_i32_1 = arith.constant 0 : i32
    return %c0_i32, %c0_i32_0 : i32, i32
  }
  func.func @transform_4(%arg0: i32) -> (i32, i32) {
    %c0_i32 = arith.constant 0 : i32
    %c0_i32_0 = arith.constant 0 : i32
    %c0_i32_1 = arith.constant 0 : i32
    return %c0_i32, %c0_i32_0 : i32, i32
  }
  func.func @transform_5(%arg0: i32) -> (i32, i32) {
    %c0_i32 = arith.constant 0 : i32
    %c0_i32_0 = arith.constant 0 : i32
    %c0_i32_1 = arith.constant 0 : i32
    return %c0_i32, %c0_i32_0 : i32, i32
  }
  func.func @transform_6(%arg0: i32) -> (i32, i32, i32) {
    %c0_i32 = arith.constant 0 : i32
    %c0_i32_0 = arith.constant 0 : i32
    %c0_i32_1 = arith.constant 0 : i32
    return %arg0, %c0_i32, %c0_i32_0 : i32, i32, i32
  }
}

</mosaic_0001>

<bundles_post_ra>
// kernel: tpu_custom_call.1
= control target key start
LH: loop header
LB: loop body
LE: loop exit
PB: predicated region body
PF: predicated region fallthrough
CT: control target
= control target key end

     0   :  { %11 = vsyncpa [#allocation3], 0  ;;  %s5664_s0 = inlined_call_operand.hbm [shape: f32[2,8,384], index: 0, kind: input, shape index: {}]   ;;  %s5665_s1 = inlined_call_operand.hbm [shape: bf16[384,384], index: 1, kind: input, shape index: {}]   ;;  %s5666_s2 = inlined_call_operand.hbm [shape: bf16[384,384], index: 2, kind: input, shape index: {}]   ;;  %s5667_s3 = inlined_call_operand.hbm [shape: bf16[384,384], index: 3, kind: input, shape index: {}]   ;;  %s5668_s4 = inlined_call_operand.hbm [shape: bf16[384,384], index: 4, kind: input, shape index: {}]   ;;  %s5669_s5 = inlined_call_operand.vmem [shape: f32[1,384], index: 5, kind: input, shape index: {}]   ;;  %s5670_s6 = inlined_call_operand.hbm [shape: f32[2,8,384], index: 6, kind: output, shape index: {}]  }
   0x1   :  { %13 = vsyncpa [#allocation3 + $0x1], 0 }
   0x2   :  { %14 = vsyncpa [#allocation6], 0 }
   0x3   :  { %15 = vsyncpa [#allocation9], 0 }
   0x4   :  { %16 = vsyncpa [#allocation4], 0 }
   0x5   :  { %18 = vsyncpa [#allocation4 + $0x1], 0  ;;  %s5151_s21 = smov 0   ;;  %s5153_s22 = smov 0  }
   0x6   :  { %s5155_s23 = smov 0   ;;  %s5157_s24 = smov 0  }
   0x7 LB: > { %s5104_s25 = smov [#allocation5]   ;;  %s5172_s27 = sadd.s32 4294967295, %s5102_s24   ;;  %s5102_s24 = sphi %s5157_s24, %s5695_s24   ;;  %s5098_s23 = sphi %s5155_s23, %s5694_s23   ;;  %s5094_s22 = sphi %s5153_s22, %s5693_s22   ;;  %s5090_s21 = sphi %s5151_s21, %s5692_s21  }
   0x8   : > { %s198_s26 = sshll.u32 %s5104_s25, 4  ;;  %p3743_p0 = scmp.ge.s32.totalorder %s5102_s24, 1  ;;  %s5177_s26 = int_to_ptr.vmem [resolvable:$true] %s198_s26 }
   0x9   : > { %p5671_p1 = scmp.eq.s32.totalorder %s5172_s27, 0  ;;  %p186_p2 = scmp.lt.s32.totalorder %s5102_s24, 3 }
   0xa   : > { %s5105_s29 = smov [#allocation8]   ;;  %s5106_s8 = smov [#allocation7]  }
   0xb   : > { %p5179_p3 = pnand %p3743_p0, %p186_p2  ;;  %s224_s30 = sshll.u32 %s5105_s29, 4  ;;  %s5192_s30 = int_to_ptr.vmem [resolvable:$true] %s224_s30 }
   0xc   : > { %s211_s9 = sshll.u32 %s5106_s8, 4  ;;  %s4886_s12 = scalar_lea.hbm %s5665_s1, 9216  ;;  %s5194_s9 = int_to_ptr.vmem [resolvable:$true] %s211_s9 }
   0xd   : > { %s5674_s28 = scalar_select %p5179_p3, 1, 0 }
   0xe   : > { %p4400_p5 = pneg %p5179_p3  ;;  %p4887_p7 = scmp.ne.s32.totalorder %s5665_s1, %s4886_s12 }
   0xf   : > { %p4893_p11 = scmp.lt.u32.totalorder %s4886_s12, %s5665_s1 }
  0x10   : > { %p5188_p6 = pnand %p4400_p5, %p5671_p1 }
  0x12   : > { %p5204_p8 = pneg %p5188_p6 }
  0x14   : > { %p4889_p9 = pnand %p5204_p8, %p4887_p7 }
  0x16   : > { %p4890_p10 = pneg %p4889_p9 }
  0x18   : > { %p4895_p12 = pnand %p4893_p11, %p4890_p10 }
  0x1a   : > { %4898 = shalt.err (!%p4895_p12)
}
  0x1b   : > { %s4899_s18 = scalar_lea.vmem %s5177_s26, 9216  ;;  %p4907_p5 = scmp.lt.s32.totalorder %s5177_s26, %s5177_s26 }
  0x1c   : > { %p4900_p13 = scmp.ne.s32.totalorder %s5177_s26, %s4899_s18  ;;  %p4908_p4 = scmp.lt.s32.totalorder %s4899_s18, %s4899_s18 }
  0x1e   : > { %p4902_p0 = pnand %p4900_p13, %p5204_p8  ;;  %p4909_p7 = por %p4908_p4, %p4907_p5 }
  0x20   : > { %p4903_p2 = pneg %p4902_p0 }
  0x22   : > { %p4910_p9 = pnand %p4909_p7, %p4903_p2 }
  0x24   : > { %4913 = shalt.err (!%p4910_p9)
}
  0x25   : > { %s5107_s19 = smov 192   ;;  %s5108_s20 = smov 12  }
  0x26   : > { %4403 = dma.hbm_to_vmem [thread:$0]  (!%p5188_p6), %s5665_s1, 9216, %s5177_s26, [#allocation6], %s5107_s19, %s5107_s19, %s5108_s20  }
  0x27   : > { %s4914_s11 = scalar_lea.hbm %s5667_s3, 9216 }
  0x28   : > { %p4915_p4 = scmp.ne.s32.totalorder %s5667_s3, %s4914_s11  ;;  %p4921_p12 = scmp.lt.u32.totalorder %s4914_s11, %s5667_s3 }
  0x2a   : > { %p4917_p10 = pnand %p4915_p4, %p5204_p8 }
  0x2c   : > { %p4918_p11 = pneg %p4917_p10 }
  0x2e   : > { %p4923_p13 = pnand %p4921_p12, %p4918_p11 }
  0x30   : > { %4926 = shalt.err (!%p4923_p13)
}
  0x31   : > { %s4927_s26 = scalar_lea.vmem %s5192_s30, 9216  ;;  %p4935_p7 = scmp.lt.s32.totalorder %s5192_s30, %s5192_s30 }
  0x32   : > { %p4928_p0 = scmp.ne.s32.totalorder %s5192_s30, %s4927_s26  ;;  %p4936_p9 = scmp.lt.s32.totalorder %s4927_s26, %s4927_s26 }
  0x34   : > { %p4930_p2 = pnand %p4928_p0, %p5204_p8  ;;  %p4937_p4 = por %p4936_p9, %p4935_p7 }
  0x36   : > { %p4931_p5 = pneg %p4930_p2 }
  0x38   : > { %p4938_p10 = pnand %p4937_p4, %p4931_p5 }
  0x3a   : > { %4941 = shalt.err (!%p4938_p10)
}
  0x3b   : > { %4409 = dma.hbm_to_vmem [thread:$0]  (!%p5188_p6), %s5667_s3, 9216, %s5192_s30, [#allocation9], %s5107_s19, %s5107_s19, %s5108_s20  }
  0x3c   : > { %s4942_s8 = scalar_lea.hbm %s5666_s2, 9216 }
  0x3d   : > { %p4943_p11 = scmp.ne.s32.totalorder %s5666_s2, %s4942_s8  ;;  %p4949_p0 = scmp.lt.u32.totalorder %s4942_s8, %s5666_s2 }
  0x3f   : > { %p4945_p12 = pnand %p4943_p11, %p5204_p8 }
  0x41   : > { %p4946_p13 = pneg %p4945_p12 }
  0x43   : > { %p4951_p2 = pnand %p4949_p0, %p4946_p13 }
  0x45   : > { %4954 = shalt.err (!%p4951_p2)
}
  0x46   : > { %s4955_s30 = scalar_lea.vmem %s5194_s9, 9216  ;;  %p4963_p4 = scmp.lt.s32.totalorder %s5194_s9, %s5194_s9 }
  0x47   : > { %p4956_p5 = scmp.ne.s32.totalorder %s5194_s9, %s4955_s30  ;;  %p4964_p10 = scmp.lt.s32.totalorder %s4955_s30, %s4955_s30 }
  0x49   : > { %p4958_p7 = pnand %p4956_p5, %p5204_p8  ;;  %p4965_p11 = por %p4964_p10, %p4963_p4 }
  0x4b   : > { %p4959_p9 = pneg %p4958_p7 }
  0x4d   : > { %p4966_p12 = pnand %p4965_p11, %p4959_p9 }
  0x4f   : > { %4969 = shalt.err (!%p4966_p12)
}
  0x50   : > { %4406 = dma.hbm_to_vmem [thread:$0]  (!%p5188_p6), %s5666_s2, 9216, %s5194_s9, [#allocation6], %s5107_s19, %s5107_s19, %s5108_s20  }
  0x51   : > { %s5109_s26 = smov [#allocation10]   ;;  %s4970_s29 = scalar_lea.hbm %s5668_s4, 9216 }
  0x52   : > { %s237_s17 = sshll.u32 %s5109_s26, 4  ;;  %p4971_p13 = scmp.ne.s32.totalorder %s5668_s4, %s4970_s29  ;;  %s238_s17 = int_to_ptr.vmem [resolvable:$true] %s237_s17 }
  0x53   : > { %p4977_p5 = scmp.lt.u32.totalorder %s4970_s29, %s5668_s4 }
  0x54   : > { %p4973_p0 = pnand %p4971_p13, %p5204_p8 }
  0x56   : > { %p4974_p2 = pneg %p4973_p0 }
  0x58   : > { %p4979_p7 = pnand %p4977_p5, %p4974_p2 }
  0x5a   : > { %4982 = shalt.err (!%p4979_p7)
}
  0x5b   : > { %s4983_s9 = scalar_lea.vmem %s238_s17, 9216  ;;  %p4991_p11 = scmp.lt.s32.totalorder %s238_s17, %s238_s17 }
  0x5c   : > { %p4984_p9 = scmp.ne.s32.totalorder %s238_s17, %s4983_s9  ;;  %p4992_p12 = scmp.lt.s32.totalorder %s4983_s9, %s4983_s9 }
  0x5e   : > { %p4986_p4 = pnand %p4984_p9, %p5204_p8  ;;  %p4993_p1 = por %p4992_p12, %p4991_p11 }
  0x60   : > { %p4987_p10 = pneg %p4986_p4 }
  0x62   : > { %p4994_p3 = pnand %p4993_p1, %p4987_p10 }
  0x64   : > { %4997 = shalt.err (!%p4994_p3)
}
  0x65   : > { %4412 = dma.hbm_to_vmem [thread:$0]  (!%p5188_p6), %s5668_s4, 9216, %s238_s17, [#allocation9], %s5107_s19, %s5107_s19, %s5108_s20  }
  0x66   : > { %s3742_s7 = sadd.s32 4294967294, %s5102_s24   ;;  %s5303_s15 = sadd.s32 1, %s5102_s24  }
  0x67   : > { %s28_s14 = ssub.s32 %s5102_s24, %s5303_s15  ;;  %s31_s16 = sadd.s32 1, %s5098_s23 }
  0x68   : > { %p29_p1 = scmp.eq.s32.totalorder %s28_s14, 0  ;;  %p38_p3 = scmp.ne.s32.totalorder %s5098_s23, %s5094_s22 }
  0x69   : > { %p39_p8 = scmp.eq.s32.totalorder %s5102_s24, 0  ;;  %p44_p13 = scmp.ne.s32.totalorder %s5094_s22, %s5090_s21 }
  0x6a   : > { %s5314_s26 = scalar_select %p29_p1, %s5098_s23, %s31_s16  }
  0x6b   : > { %p40_p0 = por %p39_p8, %p38_p3  ;;  %p5677_p2 = scmp.eq.s32.totalorder %s5172_s27, 0 }
  0x6c   : > { %p173_p6 = scmp.eq.s32.totalorder %s5172_s27, 1  ;;  %p179_p7 = scmp.eq.s32.totalorder %s3742_s7, 1 }
  0x6d   : > { %p5318_p5 = por %p5677_p2, %p44_p13  ;;  %p4425_p9 = scmp.lt.s32.totalorder %s5102_s24, 2 }
  0x6e   : > { %s254_s19 = sand.u32 1, %s5098_s23   ;;  %p5325_p4 = por %p173_p6, %p38_p3 }
  0x6f   : > { %p5329_p10 = por %p179_p7, %p44_p13  ;;  %s4376_s25 = smul.u32 24, %s254_s19 }
  0x70   : > { %s5679_s20 = scalar_select %p5325_p4, 1, 0 }
  0x71   : > { %s5680_s17 = scalar_select %p5329_p10, 1, 0 }
  0x72   : > { %s4377_s29 = smul.u32 384, %s5102_s24  ;;  %p5334_p11 = pnand %p4425_p9, %p40_p0 }
  0x73   : > { %s258_s9 = scalar_lea.vmem [#allocation2], %s4376_s25  ;;  %s255_s30 = scalar_lea.sflag [#allocation3], %s254_s19 }
  0x74   : > { %s5341_s12 = scalar_lea.hbm %s5664_s0, %s4377_s29  ;;  %s266_s13 = sshll.u32 %s258_s9, 4  ;;  %s5343_s13 = int_to_ptr.vmem [resolvable:$true] %s266_s13 }
  0x75   : > { %s4998_s7 = scalar_lea.hbm %s5341_s12, 384  ;;  %p5000_p1 = pneg %p5334_p11 }
  0x76   : > { %p4999_p12 = scmp.ne.s32.totalorder %s5341_s12, %s4998_s7  ;;  %s5003_s29 = scalar_lea.hbm %s5664_s0, 768 }
  0x77   : > { %p5004_p13 = scmp.lt.u32.totalorder %s5341_s12, %s5664_s0  ;;  %p5005_p0 = scmp.lt.u32.totalorder %s5003_s29, %s4998_s7 }
  0x78   : > { %p5001_p3 = pnand %p5000_p1, %p4999_p12  ;;  %p5007_p6 = scmp.lt.u32.totalorder %s4998_s7, %s5341_s12 }
  0x79   : > { %p5006_p2 = por %p5005_p0, %p5004_p13 }
  0x7a   : > { %p5002_p8 = pneg %p5001_p3 }
  0x7b   : > { %p5008_p7 = por %p5007_p6, %p5006_p2 }
  0x7d   : > { %p5009_p9 = pnand %p5008_p7, %p5002_p8 }
  0x7f   : > { %5012 = shalt.err (!%p5009_p9)
}
  0x80   : > { %s5013_s19 = scalar_lea.vmem %s5343_s13, 384  ;;  %s5110_s25 = smov [#allocation2]  }
  0x81   : > { %p5014_p12 = scmp.ne.s32.totalorder %s5343_s13, %s5013_s19  ;;  %s5018_s9 = sshll.u32 %s5110_s25, 4  ;;  %s5019_s9 = int_to_ptr.vmem [resolvable:$false] %s5018_s9 }
  0x82   : > { %s5020_s14 = scalar_lea.vmem %s5019_s9, 768  ;;  %p5021_p4 = scmp.lt.s32.totalorder %s5343_s13, %s5019_s9 }
  0x83   : > { %p5016_p3 = pnand %p5014_p12, %p5000_p1  ;;  %p5022_p13 = scmp.lt.s32.totalorder %s5020_s14, %s5013_s19 }
  0x85   : > { %p5017_p10 = pneg %p5016_p3  ;;  %p5023_p0 = por %p5022_p13, %p5021_p4 }
  0x87   : > { %p5024_p2 = pnand %p5023_p0, %p5017_p10 }
  0x89   : > { %5027 = shalt.err (!%p5024_p2)
}
  0x8a   : > { %4416 = dma.hbm_to_vmem [thread:$0]  (!%p5334_p11), %s5341_s12, 384, %s5343_s13, %s255_s30  }
  0x8b   : > { %p5682_p8 = scmp.ne.s32.totalorder %s5674_s28, 0 }
  0x8c   : > { %s5373_s7 = sand.u32 (!%p5682_p8), 1, %s5094_s22  }
  0x8d   : > { %275 = sbr.rel (%p5682_p8) target bundleno = 3283 (0xcd3), region = 44  ;;  %s278_s29 = scalar_lea.sflag (!%p5682_p8), [#allocation3], %s5373_s7 }
  0x8e   : > { %s4378_s16 = smul.u32 (!%p5682_p8), 24, %s5373_s7 }
  0x90   : > { %s5379_s10 = scalar_lea.vmem (!%p5682_p8), [#allocation2], %s4378_s16 }
  0x94   : > { %5073 = dma.done.wait (%p5318_p5), %s278_s29, 384  }
  0x95   : > { %5075 = vsyncadd (%p5318_p5), %s278_s29, 4294966912  ;;  %p5683_p4 = scmp.eq.s32.totalorder %s5172_s27, 0 }
  0x97   : > { %5077 = dma.done.wait (%p5683_p4), [#allocation6], 18432   ;;  %p5684_p10 = pmov %p5683_p4 }
  0x98   : > { %p5685_p11 = pmov %p5683_p4 }
  0x99   : > { %5079 = vsyncadd (%p5684_p10), [#allocation6], 4294948864 }
  0x9a   : > { %5081 = dma.done.wait (%p5685_p11), [#allocation9], 18432   ;;  %p5686_p1 = pmov %p5683_p4 }
  0x9b   : > { %v4478_v0 = vld [vmem:[#allocation5 + $0x4] ss:$12 sps:$4 sm:$0xff]   ;;  %v4480_v1 = vld [vmem:[#allocation5 + $0xc8] ss:$12 sps:$4 sm:$0xff]   ;;  %v4481_v2 = vld [vmem:[#allocation5] ss:$12 sps:$4 sm:$0xff]  }
  0x9c   : > { %5083 = vsyncadd (%p5686_p1), [#allocation9], 4294948864  ;;  %813 = vmatprep.subr.bf16.mxu0 %v4478_v0  ;;  %4058 = vmatprep.subr.bf16.mxu1 %v4480_v1  ;;  %v4482_v3 = vld [vmem:[#allocation5 + $0x8] ss:$12 sps:$4 sm:$0xff]   ;;  %v4485_v5 = vld [vmem:[#allocation5 + $0xe0] ss:$12 sps:$4 sm:$0xff]  }
  0x9d   : > { %814 = vmatpush1.bf16.msra.mxu0 %v4481_v2  ;;  %v4483_v4 = vld [vmem:[#allocation5 + $0x1c] ss:$12 sps:$4 sm:$0xff]   ;;  %4059 = vmatpush3.bf16.msra.mxu1 %v4482_v3  ;;  %v4486_v6 = vld [vmem:[#allocation5 + $0x18] ss:$12 sps:$4 sm:$0xff]   ;;  %v4487_v7 = vld [vmem:[#allocation5 + $0x20] ss:$12 sps:$4 sm:$0xff]  }
  0x9e   : > { %815 = vmatprep.subr.bf16.mxu0 %v4483_v4  ;;  %4060 = vmatprep.subr.bf16.mxu1 %v4485_v5  ;;  %v4488_v8 = vld [vmem:[#allocation5 + $0x34] ss:$12 sps:$4 sm:$0xff]   ;;  %v4490_v9 = vld [vmem:[#allocation5 + $0xf8] ss:$12 sps:$4 sm:$0xff]   ;;  %v4491_v10 = vld [vmem:[#allocation5 + $0x30] ss:$12 sps:$4 sm:$0xff]  }
  0x9f   : > { %v4492_v11 = vld [vmem:[#allocation5 + $0x38] ss:$12 sps:$4 sm:$0xff]   ;;  %v4495_v13 = vld [vmem:[#allocation5 + $0x110] ss:$12 sps:$4 sm:$0xff]   ;;  %v4496_v14 = vld [vmem:[#allocation5 + $0x48] ss:$12 sps:$4 sm:$0xff]  }
  0xa0   : > { %v4493_v12 = vld [vmem:[#allocation5 + $0x4c] ss:$12 sps:$4 sm:$0xff]   ;;  %v4497_v15 = vld [vmem:[#allocation5 + $0x50] ss:$12 sps:$4 sm:$0xff]   ;;  %v4500_v17 = vld [vmem:[#allocation5 + $0x128] ss:$12 sps:$4 sm:$0xff]  }
  0xa1   : > { %816 = vmatpush1.bf16.msra.mxu0 %v4486_v6  ;;  %4061 = vmatpush3.bf16.msra.mxu1 %v4487_v7  ;;  %v4498_v16 = vld [vmem:[#allocation5 + $0x64] ss:$12 sps:$4 sm:$0xff]   ;;  %v4501_v18 = vld [vmem:[#allocation5 + $0x60] ss:$12 sps:$4 sm:$0xff]   ;;  %v4502_v19 = vld [vmem:[#allocation5 + $0x68] ss:$12 sps:$4 sm:$0xff]  }
  0xa2   : > { %817 = vmatprep.subr.bf16.mxu0 %v4488_v8  ;;  %4062 = vmatprep.subr.bf16.mxu1 %v4490_v9  ;;  %v4503_v20 = vld [vmem:[#allocation5 + $0x7c] ss:$12 sps:$4 sm:$0xff]   ;;  %v4505_v21 = vld [vmem:[#allocation5 + $0x140] ss:$12 sps:$4 sm:$0xff]   ;;  %v4506_v22 = vld [vmem:[#allocation5 + $0x78] ss:$12 sps:$4 sm:$0xff]  }
  0xa3   : > { %v4507_v23 = vld [vmem:[#allocation5 + $0x80] ss:$12 sps:$4 sm:$0xff]   ;;  %v4510_v25 = vld [vmem:[#allocation5 + $0x158] ss:$12 sps:$4 sm:$0xff]   ;;  %v4511_v26 = vld [vmem:[#allocation5 + $0x90] ss:$12 sps:$4 sm:$0xff]  }
  0xa4   : > { %v4508_v24 = vld [vmem:[#allocation5 + $0x94] ss:$12 sps:$4 sm:$0xff]   ;;  %v4512_v27 = vld [vmem:[#allocation5 + $0x98] ss:$12 sps:$4 sm:$0xff]   ;;  %v4515_v29 = vld [vmem:[#allocation5 + $0x170] ss:$12 sps:$4 sm:$0xff]  }
  0xa5   : > { %818 = vmatpush1.bf16.msra.mxu0 %v4491_v10  ;;  %4063 = vmatpush3.bf16.msra.mxu1 %v4492_v11  ;;  %v4513_v28 = vld [vmem:[#allocation5 + $0xac] ss:$12 sps:$4 sm:$0xff]   ;;  %v4516_v31 = vld [vmem:[#allocation5 + $0xa8] ss:$12 sps:$4 sm:$0xff]   ;;  %v4517_v33 = vld [vmem:[#allocation5 + $0xb0] ss:$12 sps:$4 sm:$0xff]  }
  0xa6   : > { %819 = vmatprep.subr.bf16.mxu0 %v4493_v12  ;;  %4064 = vmatprep.subr.bf16.mxu1 %v4495_v13  ;;  %v328_v30 = vld [vmem:[%s5379_s10 + $0x8] sm:$0xff]  ;;  %v327_v35 = vld [vmem:[%s5379_s10] sm:$0xff]  ;;  %v5111_v40 = vmov 0.0   ;;  %vm5112_vm0 = vmmov 0   ;;  %v329_v62 = vld [vmem:[%s5379_s10 + $0x10] sm:$0xff]  ;;  %v5113_v9 = vmov 0  }
  0xa7   : > { %v5394_v32 = vpack.c.bf16 %v328_v30, %v328_v30  ;;  %v4518_v34 = vld [vmem:[#allocation5 + $0xc4] ss:$12 sps:$4 sm:$0xff]   ;;  %v4520_v36 = vld [vmem:[#allocation5 + $0xc0] ss:$12 sps:$4 sm:$0xff]   ;;  %v5399_v37 = vpack.c.bf16 %v327_v35, %v327_v35  ;;  %v4521_v38 = vld [vmem:[#allocation5 + $0x188] ss:$12 sps:$4 sm:$0xff]   ;;  %v5413_v1 = vpack.c.bf16 %v329_v62, %v329_v62 }
  0xa8   : > { %v4522_v39 = vld [vmem:[#allocation5 + $0xdc] ss:$12 sps:$4 sm:$0xff]   ;;  %v4524_v41 = vld [vmem:[#allocation5 + $0xd8] ss:$12 sps:$4 sm:$0xff]   ;;  %v4525_v42 = vld [vmem:[#allocation5 + $0x1a0] ss:$12 sps:$4 sm:$0xff]  }
  0xa9   : > { %820 = vmatpush1.bf16.msra.mxu0 %v4496_v14  ;;  %4065 = vmatpush3.bf16.msra.mxu1 %v4497_v15  ;;  %v4526_v43 = vld [vmem:[#allocation5 + $0xf4] ss:$12 sps:$4 sm:$0xff]   ;;  %v4528_v44 = vld [vmem:[#allocation5 + $0xf0] ss:$12 sps:$4 sm:$0xff]   ;;  %v4529_v45 = vld [vmem:[#allocation5 + $0x1b8] ss:$12 sps:$4 sm:$0xff]  }
  0xaa   : > { %821 = vmatprep.subr.bf16.mxu0 %v4498_v16  ;;  %4066 = vmatprep.subr.bf16.mxu1 %v4500_v17  ;;  %v4530_v46 = vld [vmem:[#allocation5 + $0x10c] ss:$12 sps:$4 sm:$0xff]   ;;  %v4532_v47 = vld [vmem:[#allocation5 + $0x108] ss:$12 sps:$4 sm:$0xff]   ;;  %v4533_v48 = vld [vmem:[#allocation5 + $0x1d0] ss:$12 sps:$4 sm:$0xff]  }
  0xab   : > { %927 = vmatprep.mubr.bf16.mxu1 %v5394_v32  ;;  %845 = vmatprep.mubr.bf16.mxu0 %v5394_v32  ;;  %v4534_v49 = vld [vmem:[#allocation5 + $0x124] ss:$12 sps:$4 sm:$0xff]   ;;  %v4536_v50 = vld [vmem:[#allocation5 + $0x120] ss:$12 sps:$4 sm:$0xff]   ;;  %v4537_v51 = vld [vmem:[#allocation5 + $0x1e8] ss:$12 sps:$4 sm:$0xff]  }
  0xac   : > { %v4538_v52 = vld [vmem:[#allocation5 + $0x13c] ss:$12 sps:$4 sm:$0xff]   ;;  %v4540_v53 = vld [vmem:[#allocation5 + $0x138] ss:$12 sps:$4 sm:$0xff]   ;;  %v4541_v54 = vld [vmem:[#allocation5 + $0x200] ss:$12 sps:$4 sm:$0xff]  }
  0xad   : > { %822 = vmatpush1.bf16.msra.mxu0 %v4501_v18  ;;  %4067 = vmatpush3.bf16.msra.mxu1 %v4502_v19  ;;  %v4542_v55 = vld [vmem:[#allocation5 + $0x154] ss:$12 sps:$4 sm:$0xff]   ;;  %v4544_v56 = vld [vmem:[#allocation5 + $0x150] ss:$12 sps:$4 sm:$0xff]   ;;  %v4545_v57 = vld [vmem:[#allocation5 + $0x218] ss:$12 sps:$4 sm:$0xff]  }
  0xae   : > { %823 = vmatprep.subr.bf16.mxu0 %v4503_v20  ;;  %4068 = vmatprep.subr.bf16.mxu1 %v4505_v21  ;;  %v4546_v58 = vld [vmem:[#allocation5 + $0x16c] ss:$12 sps:$4 sm:$0xff]   ;;  %v4548_v59 = vld [vmem:[#allocation5 + $0x168] ss:$12 sps:$4 sm:$0xff]   ;;  %v4549_v60 = vld [vmem:[#allocation5 + $0x230] ss:$12 sps:$4 sm:$0xff]  }
  0xaf   : > { %v4552_v61 = vld [vmem:[#allocation5 + $0x184] ss:$12 sps:$4 sm:$0xff]   ;;  %v4550_v0 = vld [vmem:[#allocation5 + $0x180] ss:$12 sps:$4 sm:$0xff]   ;;  %v4558_v3 = vld [vmem:[#allocation5 + $0x19c] ss:$12 sps:$4 sm:$0xff]  }
  0xb0   : > { %v4555_v63 = vld [vmem:[#allocation7 + $0x4] ss:$12 sps:$4 sm:$0xff]   ;;  %v4553_v2 = vld [vmem:[#allocation7] ss:$12 sps:$4 sm:$0xff]   ;;  %v4561_v4 = vld [vmem:[#allocation7 + $0x1c] ss:$12 sps:$4 sm:$0xff]  }
  0xb1   : > { %824 = vmatpush1.bf16.msra.mxu0 %v4506_v22  ;;  %4069 = vmatpush3.bf16.msra.mxu1 %v4507_v23  ;;  %v4556_v5 = vld [vmem:[#allocation5 + $0x198] ss:$12 sps:$4 sm:$0xff]   ;;  %v4564_v7 = vld [vmem:[#allocation5 + $0x1b4] ss:$12 sps:$4 sm:$0xff]   ;;  %v4562_v10 = vld [vmem:[#allocation5 + $0x1b0] ss:$12 sps:$4 sm:$0xff]  }
  0xb2   : > { %825 = vmatprep.subr.bf16.mxu0 %v4508_v24  ;;  %4070 = vmatprep.subr.bf16.mxu1 %v4510_v25  ;;  %v4559_v6 = vld [vmem:[#allocation7 + $0x18] ss:$12 sps:$4 sm:$0xff]   ;;  %v4567_v8 = vld [vmem:[#allocation7 + $0x34] ss:$12 sps:$4 sm:$0xff]   ;;  %v4565_v11 = vld [vmem:[#allocation7 + $0x30] ss:$12 sps:$4 sm:$0xff]  }
  0xb3   : > { %v4570_v12 = vld [vmem:[#allocation5 + $0x1cc] ss:$12 sps:$4 sm:$0xff]   ;;  %v4568_v14 = vld [vmem:[#allocation5 + $0x1c8] ss:$12 sps:$4 sm:$0xff]   ;;  %v4576_v16 = vld [vmem:[#allocation5 + $0x1e4] ss:$12 sps:$4 sm:$0xff]  }
  0xb4   : > { %v4573_v13 = vld [vmem:[#allocation7 + $0x4c] ss:$12 sps:$4 sm:$0xff]   ;;  %v4571_v15 = vld [vmem:[#allocation7 + $0x48] ss:$12 sps:$4 sm:$0xff]   ;;  %v4579_v17 = vld [vmem:[#allocation7 + $0x64] ss:$12 sps:$4 sm:$0xff]  }
  0xb5   : > { %826 = vmatpush1.bf16.msra.mxu0 %v4511_v26  ;;  %4071 = vmatpush3.bf16.msra.mxu1 %v4512_v27  ;;  %v4574_v18 = vld [vmem:[#allocation5 + $0x1e0] ss:$12 sps:$4 sm:$0xff]   ;;  %v4582_v20 = vld [vmem:[#allocation5 + $0x1fc] ss:$12 sps:$4 sm:$0xff]   ;;  %v4580_v22 = vld [vmem:[#allocation5 + $0x1f8] ss:$12 sps:$4 sm:$0xff]  }
  0xb6   : > { %827 = vmatprep.subr.bf16.mxu0 %v4513_v28  ;;  %4072 = vmatprep.subr.bf16.mxu1 %v4515_v29  ;;  %v4577_v19 = vld [vmem:[#allocation7 + $0x60] ss:$12 sps:$4 sm:$0xff]   ;;  %v4585_v21 = vld [vmem:[#allocation7 + $0x7c] ss:$12 sps:$4 sm:$0xff]   ;;  %v4583_v23 = vld [vmem:[#allocation7 + $0x78] ss:$12 sps:$4 sm:$0xff]  }
  0xb7   : > { %v4588_v24 = vld [vmem:[#allocation5 + $0x214] ss:$12 sps:$4 sm:$0xff]   ;;  %v4586_v26 = vld [vmem:[#allocation5 + $0x210] ss:$12 sps:$4 sm:$0xff]   ;;  %v4594_v28 = vld [vmem:[#allocation5 + $0x22c] ss:$12 sps:$4 sm:$0xff]  }
  0xb8   : > { %v4591_v25 = vld [vmem:[#allocation7 + $0x94] ss:$12 sps:$4 sm:$0xff]   ;;  %v4589_v27 = vld [vmem:[#allocation7 + $0x90] ss:$12 sps:$4 sm:$0xff]   ;;  %v4597_v29 = vld [vmem:[#allocation7 + $0xac] ss:$12 sps:$4 sm:$0xff]  }
  0xb9   : > { %828 = vmatpush1.bf16.msra.mxu0 %v4516_v31  ;;  %4073 = vmatpush3.bf16.msra.mxu1 %v4517_v33  ;;  %v4592_v30 = vld [vmem:[#allocation5 + $0x228] ss:$12 sps:$4 sm:$0xff]   ;;  %v4628_v62 = vld [vmem:[#allocation7 + $0x150] ss:$12 sps:$4 sm:$0xff]   ;;  %vm2267_vm1 = vcmask 523264   ;;  %s5114_s28 = smov 64  }
  0xba   : > { %829 = vmatprep.subr.bf16.mxu0 %v4518_v34  ;;  %4206 = vmatprep.subr.bf16.mxu1 %v5111_v40  ;;  %v4595_v31 = vld [vmem:[#allocation7 + $0xa8] ss:$12 sps:$4 sm:$0xff]   ;;  %v4600_v34 = vld [vmem:[#allocation7 + $0xc4] ss:$12 sps:$4 sm:$0xff]   ;;  %vm2332_vm2 = vcmask 1043456   ;;  %vm2316_vm4 = vcmask 64512  }
  0xbb   : > { %v4601_v33 = vld [vmem:[#allocation7 + $0xc8] ss:$12 sps:$4 sm:$0xff]   ;;  %s4379_s12 = smul.u32 384, %s5172_s27  ;;  %s325_s13 = scalar_lea.vmem [#allocation11], %s4378_s16 }
  0xbc   : > { %928 = vmatmul.mubr.bf16.vlgmr.msra.gmra.mrb[0].mxu1 %v5399_v37  ;;  %v4602_v35 = vld [vmem:[#allocation7 + $0x8] ss:$12 sps:$4 sm:$0xff]   ;;  %s3634_s30 = sshll.u32 %s325_s13, 4  ;;  %s3620_s27 = scalar_lea.sflag [#allocation4], %s5373_s7  ;;  %s5622_s30 = int_to_ptr.vmem [resolvable:$true] %s3634_s30 }
  0xbd   : > { %830 = vmatpush1.bf16.msra.mxu0 %v4520_v36  ;;  %4207 = vmatpush3.bf16.msra.mxu1 %v4521_v38  ;;  %v4598_v36 = vld [vmem:[#allocation7 + $0xc0] ss:$12 sps:$4 sm:$0xff]   ;;  %s5620_s25 = scalar_lea.hbm %s5670_s6, %s4379_s12  ;;  %s5028_s9 = scalar_lea.vmem %s5622_s30, 384 }
  0xbe   : > { %831 = vmatprep.subr.bf16.mxu0 %v4522_v39  ;;  %4208 = vmatprep.subr.bf16.mxu1 %v5111_v40  ;;  %v4606_v38 = vld [vmem:[#allocation7 + $0xe0] ss:$12 sps:$4 sm:$0xff]   ;;  %v4605_v39 = vld [vmem:[#allocation7 + $0xdc] ss:$12 sps:$4 sm:$0xff]   ;;  %p5029_p5 = scmp.ne.s32.totalorder %s5622_s30, %s5028_s9  ;;  %p5689_p6 = scmp.ne.s32.totalorder %s5679_s20, 0 }
  0xbf   : > { %4222 = vmatprep.mubr.msk.bf16.mxu1 %vm5112_vm0, %v5111_v40  ;;  %s5115_s14 = smov [#allocation11]  }
  0xc0   : > { %p5030_p7 = pnand %p5029_p5, %p5689_p6  ;;  %s5032_s16 = sshll.u32 %s5115_s14, 4  ;;  %s5033_s16 = int_to_ptr.vmem [resolvable:$false] %s5032_s16 }
  0xc1   : > { %832 = vmatpush1.bf16.msra.mxu0 %v4524_v41  ;;  %4209 = vmatpush3.bf16.msra.mxu1 %v4525_v42  ;;  %v4603_v41 = vld [vmem:[#allocation7 + $0xd8] ss:$12 sps:$4 sm:$0xff]   ;;  %v4607_v42 = vld [vmem:[#allocation7 + $0x20] ss:$12 sps:$4 sm:$0xff]   ;;  %s5034_s29 = scalar_lea.vmem %s5033_s16, 768  ;;  %p5035_p12 = scmp.lt.s32.totalorder %s5622_s30, %s5033_s16 }
  0xc2   : > { %833 = vmatprep.subr.bf16.mxu0 %v4526_v43  ;;  %4210 = vmatprep.subr.bf16.mxu1 %v5111_v40  ;;  %v4611_v43 = vld [vmem:[#allocation7 + $0xf8] ss:$12 sps:$4 sm:$0xff]   ;;  %p5031_p9 = pneg %p5030_p7  ;;  %p5036_p3 = scmp.lt.s32.totalorder %s5034_s29, %s5028_s9 }
  0xc4   : > { %p5037_p13 = por %p5036_p3, %p5035_p12 }
  0xc5   : > { %834 = vmatpush1.bf16.msra.mxu0 %v4528_v44  ;;  %4211 = vmatpush3.bf16.msra.mxu1 %v4529_v45  ;;  %v4610_v44 = vld [vmem:[#allocation7 + $0xf4] ss:$12 sps:$4 sm:$0xff]   ;;  %v4608_v45 = vld [vmem:[#allocation7 + $0xf0] ss:$12 sps:$4 sm:$0xff]  }
  0xc6   : > { %835 = vmatprep.subr.bf16.mxu0 %v4530_v46  ;;  %4212 = vmatprep.subr.bf16.mxu1 %v5111_v40  ;;  %v4612_v46 = vld [vmem:[#allocation7 + $0x38] ss:$12 sps:$4 sm:$0xff]   ;;  %p5038_p0 = pnand %p5037_p13, %p5031_p9 }
  0xc9   : > { %836 = vmatpush1.bf16.msra.mxu0 %v4532_v47  ;;  %4213 = vmatpush3.bf16.msra.mxu1 %v4533_v48  ;;  %v4616_v47 = vld [vmem:[#allocation7 + $0x110] ss:$12 sps:$4 sm:$0xff]   ;;  %v4615_v48 = vld [vmem:[#allocation7 + $0x10c] ss:$12 sps:$4 sm:$0xff]  }
  0xca   : > { %837 = vmatprep.subr.bf16.mxu0 %v4534_v49  ;;  %4214 = vmatprep.subr.bf16.mxu1 %v5111_v40  ;;  %v4617_v49 = vld [vmem:[#allocation7 + $0x50] ss:$12 sps:$4 sm:$0xff]  }
  0xcd   : > { %838 = vmatpush1.bf16.msra.mxu0 %v4536_v50  ;;  %4215 = vmatpush3.bf16.msra.mxu1 %v4537_v51  ;;  %v4613_v50 = vld [vmem:[#allocation7 + $0x108] ss:$12 sps:$4 sm:$0xff]  }
  0xce   : > { %839 = vmatprep.subr.bf16.mxu0 %v4538_v52  ;;  %4216 = vmatprep.subr.bf16.mxu1 %v5111_v40  ;;  %v4621_v51 = vld [vmem:[#allocation7 + $0x128] ss:$12 sps:$4 sm:$0xff]   ;;  %v4620_v52 = vld [vmem:[#allocation7 + $0x124] ss:$12 sps:$4 sm:$0xff]  }
  0xd1   : > { %840 = vmatpush1.bf16.msra.mxu0 %v4540_v53  ;;  %4217 = vmatpush3.bf16.msra.mxu1 %v4541_v54  ;;  %v4618_v53 = vld [vmem:[#allocation7 + $0x120] ss:$12 sps:$4 sm:$0xff]   ;;  %v4622_v54 = vld [vmem:[#allocation7 + $0x68] ss:$12 sps:$4 sm:$0xff]  }
  0xd2   : > { %841 = vmatprep.subr.bf16.mxu0 %v4542_v55  ;;  %4218 = vmatprep.subr.bf16.mxu1 %v5111_v40  ;;  %v4625_v55 = vld [vmem:[#allocation7 + $0x13c] ss:$12 sps:$4 sm:$0xff]  }
  0xd5   : > { %842 = vmatpush1.bf16.msra.mxu0 %v4544_v56  ;;  %4219 = vmatpush3.bf16.msra.mxu1 %v4545_v57  ;;  %v4626_v56 = vld [vmem:[#allocation7 + $0x140] ss:$12 sps:$4 sm:$0xff]  }
  0xd6   : > { %843 = vmatprep.subr.bf16.mxu0 %v4546_v58  ;;  %4220 = vmatprep.subr.bf16.mxu1 %v5111_v40  ;;  %v4627_v57 = vld [vmem:[#allocation7 + $0x80] ss:$12 sps:$4 sm:$0xff]   ;;  %v4623_v58 = vld [vmem:[#allocation7 + $0x138] ss:$12 sps:$4 sm:$0xff]  }
  0xd9   : > { %844 = vmatpush1.bf16.msra.mxu0 %v4548_v59  ;;  %4221 = vmatpush3.bf16.msra.mxu1 %v4549_v60  ;;  %v4631_v59 = vld [vmem:[#allocation7 + $0x158] ss:$12 sps:$4 sm:$0xff]   ;;  %v4630_v60 = vld [vmem:[#allocation7 + $0x154] ss:$12 sps:$4 sm:$0xff]  }
  0xda   : > { %854 = vmatprep.subr.bf16.mxu0 %v4552_v61  ;;  %1455 = vmatprep.subr.bf16.mxu1 %v4555_v63  ;;  %v4632_v61 = vld [vmem:[#allocation7 + $0x98] ss:$12 sps:$4 sm:$0xff]   ;;  %v4636_v63 = vld [vmem:[#allocation7 + $0x170] ss:$12 sps:$4 sm:$0xff]  }
  0xdc   : > { %846 = vmatmul.mubr.bf16.vlgmr.msra.gmra.mrb[0].mxu0 %v5399_v37  ;;  %4223 = vmatmul.mubr.bf16.vlgmr.msra.gmra.mrb[4].mxu1 %v5413_v1 }
  0xdd   : > { %855 = vmatpush1.bf16.msra.mxu0 %v4550_v0  ;;  %1456 = vmatpush1.bf16.msra.mxu1 %v4553_v2  ;;  %v4635_v0 = vld [vmem:[#allocation7 + $0x16c] ss:$12 sps:$4 sm:$0xff]   ;;  %v4637_v2 = vld [vmem:[#allocation7 + $0xb0] ss:$12 sps:$4 sm:$0xff]  }
  0xde   : > { %856 = vmatprep.subr.bf16.mxu0 %v4558_v3  ;;  %1457 = vmatprep.subr.bf16.mxu1 %v4561_v4  ;;  %v4633_v3 = vld [vmem:[#allocation7 + $0x168] ss:$12 sps:$4 sm:$0xff]   ;;  %v4640_v4 = vld [vmem:[#allocation7 + $0x184] ss:$12 sps:$4 sm:$0xff]  }
  0xdf   : > { %886 = vmatprep.mubr.bf16.mxu0 %v5113_v9  ;;  %1487 = vmatprep.mubr.bf16.mxu1 %v5394_v32 }
  0xe1   : > { %857 = vmatpush1.bf16.msra.mxu0 %v4556_v5  ;;  %1458 = vmatpush1.bf16.msra.mxu1 %v4559_v6  ;;  %v4641_v5 = vld [vmem:[#allocation7 + $0x188] ss:$12 sps:$4 sm:$0xff]   ;;  %v4638_v6 = vld [vmem:[#allocation7 + $0x180] ss:$12 sps:$4 sm:$0xff]  }
  0xe2   : > { %858 = vmatprep.subr.bf16.mxu0 %v4564_v7  ;;  %1459 = vmatprep.subr.bf16.mxu1 %v4567_v8  ;;  %v4644_v7 = vld [vmem:[#allocation7 + $0x19c] ss:$12 sps:$4 sm:$0xff]   ;;  %v4645_v8 = vld [vmem:[#allocation7 + $0x1a0] ss:$12 sps:$4 sm:$0xff]  }
  0xe5   : > { %859 = vmatpush1.bf16.msra.mxu0 %v4562_v10  ;;  %1460 = vmatpush1.bf16.msra.mxu1 %v4565_v11  ;;  %v4642_v10 = vld [vmem:[#allocation7 + $0x198] ss:$12 sps:$4 sm:$0xff]   ;;  %v4648_v11 = vld [vmem:[#allocation7 + $0x1b4] ss:$12 sps:$4 sm:$0xff]  }
  0xe6   : > { %860 = vmatprep.subr.bf16.mxu0 %v4570_v12  ;;  %1461 = vmatprep.subr.bf16.mxu1 %v4573_v13  ;;  %v4649_v12 = vld [vmem:[#allocation7 + $0x1b8] ss:$12 sps:$4 sm:$0xff]   ;;  %v4646_v13 = vld [vmem:[#allocation7 + $0x1b0] ss:$12 sps:$4 sm:$0xff]  }
  0xe9   : > { %861 = vmatpush1.bf16.msra.mxu0 %v4568_v14  ;;  %1462 = vmatpush1.bf16.msra.mxu1 %v4571_v15  ;;  %v4652_v14 = vld [vmem:[#allocation7 + $0x1cc] ss:$12 sps:$4 sm:$0xff]   ;;  %v4653_v15 = vld [vmem:[#allocation7 + $0x1d0] ss:$12 sps:$4 sm:$0xff]  }
  0xea   : > { %862 = vmatprep.subr.bf16.mxu0 %v4576_v16  ;;  %1463 = vmatprep.subr.bf16.mxu1 %v4579_v17  ;;  %v4650_v16 = vld [vmem:[#allocation7 + $0x1c8] ss:$12 sps:$4 sm:$0xff]   ;;  %v4656_v17 = vld [vmem:[#allocation7 + $0x1e4] ss:$12 sps:$4 sm:$0xff]  }
  0xed   : > { %863 = vmatpush1.bf16.msra.mxu0 %v4574_v18  ;;  %1464 = vmatpush1.bf16.msra.mxu1 %v4577_v19  ;;  %v4657_v18 = vld [vmem:[#allocation7 + $0x1e8] ss:$12 sps:$4 sm:$0xff]   ;;  %v4654_v19 = vld [vmem:[#allocation7 + $0x1e0] ss:$12 sps:$4 sm:$0xff]  }
  0xee   : > { %864 = vmatprep.subr.bf16.mxu0 %v4582_v20  ;;  %1465 = vmatprep.subr.bf16.mxu1 %v4585_v21  ;;  %v4660_v20 = vld [vmem:[#allocation7 + $0x1fc] ss:$12 sps:$4 sm:$0xff]   ;;  %v4661_v21 = vld [vmem:[#allocation7 + $0x200] ss:$12 sps:$4 sm:$0xff]  }
  0xf1   : > { %865 = vmatpush1.bf16.msra.mxu0 %v4580_v22  ;;  %1466 = vmatpush1.bf16.msra.mxu1 %v4583_v23  ;;  %v4658_v22 = vld [vmem:[#allocation7 + $0x1f8] ss:$12 sps:$4 sm:$0xff]   ;;  %v4664_v23 = vld [vmem:[#allocation7 + $0x214] ss:$12 sps:$4 sm:$0xff]  }
  0xf2   : > { %866 = vmatprep.subr.bf16.mxu0 %v4588_v24  ;;  %1467 = vmatprep.subr.bf16.mxu1 %v4591_v25  ;;  %v4665_v24 = vld [vmem:[#allocation7 + $0x218] ss:$12 sps:$4 sm:$0xff]   ;;  %v4662_v25 = vld [vmem:[#allocation7 + $0x210] ss:$12 sps:$4 sm:$0xff]  }
  0xf5   : > { %867 = vmatpush1.bf16.msra.mxu0 %v4586_v26  ;;  %1468 = vmatpush1.bf16.msra.mxu1 %v4589_v27  ;;  %v4668_v26 = vld [vmem:[#allocation7 + $0x22c] ss:$12 sps:$4 sm:$0xff]   ;;  %v4669_v27 = vld [vmem:[#allocation7 + $0x230] ss:$12 sps:$4 sm:$0xff]  }
  0xf6   : > { %868 = vmatprep.subr.bf16.mxu0 %v4594_v28  ;;  %1469 = vmatprep.subr.bf16.mxu1 %v4597_v29  ;;  %v4666_v28 = vld [vmem:[#allocation7 + $0x228] ss:$12 sps:$4 sm:$0xff]   ;;  %v4672_v29 = vld [vmem:[#allocation8 + $0x4] ss:$12 sps:$4 sm:$0xff]  }
  0xf9   : > { %869 = vmatpush1.bf16.msra.mxu0 %v4592_v30  ;;  %1470 = vmatpush1.bf16.msra.mxu1 %v4595_v31  ;;  %v4673_v30 = vld [vmem:[#allocation8 + $0xc8] ss:$12 sps:$4 sm:$0xff]   ;;  %v4670_v31 = vld [vmem:[#allocation8] ss:$12 sps:$4 sm:$0xff]  }
  0xfa   : > { %4089 = vmatprep.subr.bf16.mxu0 %v4601_v33  ;;  %1471 = vmatprep.subr.bf16.mxu1 %v4600_v34  ;;  %v4674_v33 = vld [vmem:[#allocation8 + $0x8] ss:$12 sps:$4 sm:$0xff]  }
  0xfb   : > { %v4677_v34 = vld [vmem:[#allocation8 + $0x1c] ss:$12 sps:$4 sm:$0xff]  }
  0xfc   : > { %887 = vmatmul.mubr.bf16.vlgmr.msra.gmra.mrb[0].mxu0 %v5413_v1 }
  0xfd   : > { %4090 = vmatpush3.bf16.msra.mxu0 %v4602_v35  ;;  %1569 = vmatprep.mubr.bf16.mxu0 %v5394_v32  ;;  %v4678_v35 = vld [vmem:[#allocation8 + $0xe0] ss:$12 sps:$4 sm:$0xff]  }
  0xfe   : > { %1472 = vmatpush1.bf16.msra.mxu1 %v4598_v36  ;;  %4091 = vmatprep.subr.bf16.mxu0 %v4606_v38  ;;  %v4675_v36 = vld [vmem:[#allocation8 + $0x18] ss:$12 sps:$4 sm:$0xff]   ;;  %v4679_v38 = vld [vmem:[#allocation8 + $0x20] ss:$12 sps:$4 sm:$0xff]  }
  0xff   : > { %1473 = vmatprep.subr.bf16.mxu1 %v4605_v39  ;;  %v4682_v39 = vld [vmem:[#allocation8 + $0x34] ss:$12 sps:$4 sm:$0xff]  }
 0x101   : > { %4092 = vmatpush3.bf16.msra.mxu0 %v4607_v42  ;;  %v4680_v42 = vld [vmem:[#allocation8 + $0x30] ss:$12 sps:$4 sm:$0xff]  }
 0x102   : > { %1474 = vmatpush1.bf16.msra.mxu1 %v4603_v41  ;;  %4093 = vmatprep.subr.bf16.mxu0 %v4611_v43  ;;  %v4683_v41 = vld [vmem:[#allocation8 + $0xf8] ss:$12 sps:$4 sm:$0xff]  }
 0x103   : > { %1475 = vmatprep.subr.bf16.mxu1 %v4610_v44  ;;  %v4684_v43 = vld [vmem:[#allocation8 + $0x38] ss:$12 sps:$4 sm:$0xff]  }
 0x104   : > { %v4687_v44 = vld [vmem:[#allocation8 + $0x4c] ss:$12 sps:$4 sm:$0xff]  }
 0x105   : > { %4094 = vmatpush3.bf16.msra.mxu0 %v4612_v46  ;;  %v4685_v46 = vld [vmem:[#allocation8 + $0x48] ss:$12 sps:$4 sm:$0xff]  }
 0x106   : > { %1476 = vmatpush1.bf16.msra.mxu1 %v4608_v45  ;;  %4095 = vmatprep.subr.bf16.mxu0 %v4616_v47  ;;  %v4688_v45 = vld [vmem:[#allocation8 + $0x110] ss:$12 sps:$4 sm:$0xff]  }
 0x107   : > { %1477 = vmatprep.subr.bf16.mxu1 %v4615_v48  ;;  %v4689_v47 = vld [vmem:[#allocation8 + $0x50] ss:$12 sps:$4 sm:$0xff]  }
 0x108   : > { %v4692_v48 = vld [vmem:[#allocation8 + $0x64] ss:$12 sps:$4 sm:$0xff]  }
 0x109   : > { %4096 = vmatpush3.bf16.msra.mxu0 %v4617_v49  ;;  %v4693_v49 = vld [vmem:[#allocation8 + $0x128] ss:$12 sps:$4 sm:$0xff]  }
 0x10a   : > { %1478 = vmatpush1.bf16.msra.mxu1 %v4613_v50  ;;  %4097 = vmatprep.subr.bf16.mxu0 %v4621_v51  ;;  %v4690_v50 = vld [vmem:[#allocation8 + $0x60] ss:$12 sps:$4 sm:$0xff]   ;;  %v4694_v51 = vld [vmem:[#allocation8 + $0x68] ss:$12 sps:$4 sm:$0xff]  }
 0x10b   : > { %1479 = vmatprep.subr.bf16.mxu1 %v4620_v52  ;;  %v4697_v52 = vld [vmem:[#allocation8 + $0x7c] ss:$12 sps:$4 sm:$0xff]  }
 0x10d   : > { %4098 = vmatpush3.bf16.msra.mxu0 %v4622_v54  ;;  %v4699_v54 = vld [vmem:[#allocation8 + $0x80] ss:$12 sps:$4 sm:$0xff]  }
 0x10e   : > { %1480 = vmatpush1.bf16.msra.mxu1 %v4618_v53  ;;  %4099 = vmatprep.subr.bf16.mxu0 %v4626_v56  ;;  %v4695_v53 = vld [vmem:[#allocation8 + $0x78] ss:$12 sps:$4 sm:$0xff]  }
 0x10f   : > { %1481 = vmatprep.subr.bf16.mxu1 %v4625_v55  ;;  %v4702_v55 = vld [vmem:[#allocation8 + $0x94] ss:$12 sps:$4 sm:$0xff]   ;;  %v4703_v56 = vld [vmem:[#allocation8 + $0x158] ss:$12 sps:$4 sm:$0xff]  }
 0x111   : > { %4100 = vmatpush3.bf16.msra.mxu0 %v4627_v57  ;;  %v4700_v57 = vld [vmem:[#allocation8 + $0x90] ss:$12 sps:$4 sm:$0xff]  }
 0x112   : > { %1482 = vmatpush1.bf16.msra.mxu1 %v4623_v58  ;;  %4101 = vmatprep.subr.bf16.mxu0 %v4631_v59  ;;  %v4704_v58 = vld [vmem:[#allocation8 + $0x98] ss:$12 sps:$4 sm:$0xff]  }
 0x113   : > { %1483 = vmatprep.subr.bf16.mxu1 %v4630_v60  ;;  %v4707_v59 = vld [vmem:[#allocation8 + $0xac] ss:$12 sps:$4 sm:$0xff]   ;;  %v4705_v60 = vld [vmem:[#allocation8 + $0xa8] ss:$12 sps:$4 sm:$0xff]  }
 0x115   : > { %4102 = vmatpush3.bf16.msra.mxu0 %v4632_v61  ;;  %v4708_v61 = vld [vmem:[#allocation8 + $0x170] ss:$12 sps:$4 sm:$0xff]  }
 0x116   : > { %1484 = vmatpush1.bf16.msra.mxu1 %v4628_v62  ;;  %4103 = vmatprep.subr.bf16.mxu0 %v4636_v63  ;;  %v4709_v62 = vld [vmem:[#allocation8 + $0xb0] ss:$12 sps:$4 sm:$0xff]  }
 0x117   : > { %1485 = vmatprep.subr.bf16.mxu1 %v4635_v0  ;;  %v4712_v63 = vld [vmem:[#allocation8 + $0xc4] ss:$12 sps:$4 sm:$0xff]   ;;  %v4710_v0 = vld [vmem:[#allocation8 + $0xc0] ss:$12 sps:$4 sm:$0xff]  }
 0x119   : > { %4104 = vmatpush3.bf16.msra.mxu0 %v4637_v2  ;;  %v4713_v2 = vld [vmem:[#allocation8 + $0x188] ss:$12 sps:$4 sm:$0xff]  }
 0x11a   : > { %1486 = vmatpush1.bf16.msra.mxu1 %v4633_v3  ;;  %4226 = vmatprep.subr.bf16.mxu0 %v5111_v40  ;;  %v4716_v3 = vld [vmem:[#allocation8 + $0xdc] ss:$12 sps:$4 sm:$0xff]  }
 0x11b   : > { %1496 = vmatprep.subr.bf16.mxu1 %v4640_v4  ;;  %v4714_v4 = vld [vmem:[#allocation8 + $0xd8] ss:$12 sps:$4 sm:$0xff]  }
 0x11c   : > { %1570 = vmatmul.mubr.bf16.vlgmr.msra.gmra.mrb[4].mxu0 %v5399_v37 }
 0x11d   : > { %1488 = vmatmul.mubr.bf16.vlgmr.msra.gmra.mrb[8].mxu1 %v5399_v37  ;;  %4227 = vmatpush3.bf16.msra.mxu0 %v4641_v5  ;;  %v4717_v5 = vld [vmem:[#allocation8 + $0x1a0] ss:$12 sps:$4 sm:$0xff]  }
 0x11e   : > { %1497 = vmatpush1.bf16.msra.mxu1 %v4638_v6  ;;  %4228 = vmatprep.subr.bf16.mxu0 %v5111_v40  ;;  %v4720_v6 = vld [vmem:[#allocation8 + $0xf4] ss:$12 sps:$4 sm:$0xff]  }
 0x11f   : > { %1498 = vmatprep.subr.bf16.mxu1 %v4644_v7  ;;  %1528 = vmatprep.mubr.bf16.mxu1 %v5113_v9  ;;  %v4718_v7 = vld [vmem:[#allocation8 + $0xf0] ss:$12 sps:$4 sm:$0xff]  }
 0x120   : > { %4242 = vmatprep.mubr.msk.bf16.mxu0 %vm5112_vm0, %v5111_v40 }
 0x121   : > { %4229 = vmatpush3.bf16.msra.mxu0 %v4645_v8  ;;  %v4721_v8 = vld [vmem:[#allocation8 + $0x1b8] ss:$12 sps:$4 sm:$0xff]  }
 0x122   : > { %1499 = vmatpush1.bf16.msra.mxu1 %v4642_v10  ;;  %4230 = vmatprep.subr.bf16.mxu0 %v5111_v40  ;;  %v4724_v10 = vld [vmem:[#allocation8 + $0x10c] ss:$12 sps:$4 sm:$0xff]  }
 0x123   : > { %1500 = vmatprep.subr.bf16.mxu1 %v4648_v11  ;;  %v4722_v11 = vld [vmem:[#allocation8 + $0x108] ss:$12 sps:$4 sm:$0xff]  }
 0x125   : > { %4231 = vmatpush3.bf16.msra.mxu0 %v4649_v12  ;;  %v4725_v12 = vld [vmem:[#allocation8 + $0x1d0] ss:$12 sps:$4 sm:$0xff]  }
 0x126   : > { %1501 = vmatpush1.bf16.msra.mxu1 %v4646_v13  ;;  %4232 = vmatprep.subr.bf16.mxu0 %v5111_v40  ;;  %v4728_v13 = vld [vmem:[#allocation8 + $0x124] ss:$12 sps:$4 sm:$0xff]  }
 0x127   : > { %1502 = vmatprep.subr.bf16.mxu1 %v4652_v14  ;;  %v4726_v14 = vld [vmem:[#allocation8 + $0x120] ss:$12 sps:$4 sm:$0xff]  }
 0x129   : > { %4233 = vmatpush3.bf16.msra.mxu0 %v4653_v15  ;;  %v4729_v15 = vld [vmem:[#allocation8 + $0x1e8] ss:$12 sps:$4 sm:$0xff]  }
 0x12a   : > { %1503 = vmatpush1.bf16.msra.mxu1 %v4650_v16  ;;  %4234 = vmatprep.subr.bf16.mxu0 %v5111_v40  ;;  %v4732_v16 = vld [vmem:[#allocation8 + $0x13c] ss:$12 sps:$4 sm:$0xff]  }
 0x12b   : > { %1504 = vmatprep.subr.bf16.mxu1 %v4656_v17  ;;  %v4730_v17 = vld [vmem:[#allocation8 + $0x138] ss:$12 sps:$4 sm:$0xff]  }
 0x12d   : > { %4235 = vmatpush3.bf16.msra.mxu0 %v4657_v18  ;;  %v4733_v18 = vld [vmem:[#allocation8 + $0x200] ss:$12 sps:$4 sm:$0xff]  }
 0x12e   : > { %1505 = vmatpush1.bf16.msra.mxu1 %v4654_v19  ;;  %4236 = vmatprep.subr.bf16.mxu0 %v5111_v40  ;;  %v4736_v19 = vld [vmem:[#allocation8 + $0x154] ss:$12 sps:$4 sm:$0xff]  }
 0x12f   : > { %1506 = vmatprep.subr.bf16.mxu1 %v4660_v20  ;;  %v4734_v20 = vld [vmem:[#allocation8 + $0x150] ss:$12 sps:$4 sm:$0xff]  }
 0x131   : > { %4237 = vmatpush3.bf16.msra.mxu0 %v4661_v21  ;;  %v4737_v21 = vld [vmem:[#allocation8 + $0x218] ss:$12 sps:$4 sm:$0xff]  }
 0x132   : > { %1507 = vmatpush1.bf16.msra.mxu1 %v4658_v22  ;;  %4238 = vmatprep.subr.bf16.mxu0 %v5111_v40  ;;  %v4740_v22 = vld [vmem:[#allocation8 + $0x16c] ss:$12 sps:$4 sm:$0xff]  }
 0x133   : > { %1508 = vmatprep.subr.bf16.mxu1 %v4664_v23  ;;  %v4738_v23 = vld [vmem:[#allocation8 + $0x168] ss:$12 sps:$4 sm:$0xff]  }
 0x135   : > { %4239 = vmatpush3.bf16.msra.mxu0 %v4665_v24  ;;  %v4741_v24 = vld [vmem:[#allocation8 + $0x230] ss:$12 sps:$4 sm:$0xff]  }
 0x136   : > { %1509 = vmatpush1.bf16.msra.mxu1 %v4662_v25  ;;  %4240 = vmatprep.subr.bf16.mxu0 %v5111_v40  ;;  %v4744_v25 = vld [vmem:[#allocation8 + $0x184] ss:$12 sps:$4 sm:$0xff]  }
 0x137   : > { %1510 = vmatprep.subr.bf16.mxu1 %v4668_v26  ;;  %v4742_v26 = vld [vmem:[#allocation8 + $0x180] ss:$12 sps:$4 sm:$0xff]  }
 0x139   : > { %4241 = vmatpush3.bf16.msra.mxu0 %v4669_v27  ;;  %v4747_v27 = vld [vmem:[#allocation8 + $0x19c] ss:$12 sps:$4 sm:$0xff]  }
 0x13a   : > { %1511 = vmatpush1.bf16.msra.mxu1 %v4666_v28  ;;  %2097 = vmatprep.subr.bf16.mxu0 %v4672_v29  ;;  %v4745_v28 = vld [vmem:[#allocation8 + $0x198] ss:$12 sps:$4 sm:$0xff]   ;;  %v4750_v29 = vld [vmem:[#allocation8 + $0x1b4] ss:$12 sps:$4 sm:$0xff]  }
 0x13b   : > { %4120 = vmatprep.subr.bf16.mxu1 %v4673_v30  ;;  %v4748_v30 = vld [vmem:[#allocation8 + $0x1b0] ss:$12 sps:$4 sm:$0xff]  }
 0x13c   : > { %4243 = vmatmul.mubr.bf16.vlgmr.msra.gmra.mrb[8].mxu0 %v5413_v1 }
 0x13d   : > { %1529 = vmatmul.mubr.bf16.vlgmr.msra.gmra.mrb[8].mxu1 %v5413_v1  ;;  %2098 = vmatpush1.bf16.msra.mxu0 %v4670_v31  ;;  %v4753_v31 = vld [vmem:[#allocation8 + $0x1cc] ss:$12 sps:$4 sm:$0xff]  }
 0x13e   : > { %4121 = vmatpush3.bf16.msra.mxu1 %v4674_v33  ;;  %2099 = vmatprep.subr.bf16.mxu0 %v4677_v34  ;;  %v4751_v33 = vld [vmem:[#allocation8 + $0x1c8] ss:$12 sps:$4 sm:$0xff]   ;;  %v4756_v34 = vld [vmem:[#allocation8 + $0x1e4] ss:$12 sps:$4 sm:$0xff]  }
 0x13f   : > { %4122 = vmatprep.subr.bf16.mxu1 %v4678_v35  ;;  %2211 = vmatprep.mubr.bf16.mxu1 %v5394_v32  ;;  %v4759_v35 = vld [vmem:[#allocation8 + $0x1fc] ss:$12 sps:$4 sm:$0xff]  }
 0x140   : > { %2129 = vmatprep.mubr.bf16.mxu0 %v5394_v32  ;;  %v4698_v32 = vld [vmem:[#allocation8 + $0x140] ss:$12 sps:$4 sm:$0xff]  }
 0x141   : > { %2100 = vmatpush1.bf16.msra.mxu0 %v4675_v36  ;;  %v4757_v36 = vld [vmem:[#allocation8 + $0x1f8] ss:$12 sps:$4 sm:$0xff]  }
 0x142   : > { %4123 = vmatpush3.bf16.msra.mxu1 %v4679_v38  ;;  %2101 = vmatprep.subr.bf16.mxu0 %v4682_v39  ;;  %v4762_v38 = vld [vmem:[#allocation8 + $0x214] ss:$12 sps:$4 sm:$0xff]  }
 0x143   : > { %4124 = vmatprep.subr.bf16.mxu1 %v4683_v41 }
 0x145   : > { %2102 = vmatpush1.bf16.msra.mxu0 %v4680_v42  ;;  %v4760_v42 = vld [vmem:[#allocation8 + $0x210] ss:$12 sps:$4 sm:$0xff]  }
 0x146   : > { %4125 = vmatpush3.bf16.msra.mxu1 %v4684_v43  ;;  %2103 = vmatprep.subr.bf16.mxu0 %v4687_v44 }
 0x147   : > { %4126 = vmatprep.subr.bf16.mxu1 %v4688_v45  ;;  %v4765_v45 = vld [vmem:[#allocation8 + $0x22c] ss:$12 sps:$4 sm:$0xff]  }
 0x149   : > { %2104 = vmatpush1.bf16.msra.mxu0 %v4685_v46 }
 0x14a   : > { %4127 = vmatpush3.bf16.msra.mxu1 %v4689_v47  ;;  %2105 = vmatprep.subr.bf16.mxu0 %v4692_v48  ;;  %v4763_v47 = vld [vmem:[#allocation8 + $0x228] ss:$12 sps:$4 sm:$0xff]  }
 0x14b   : > { %4128 = vmatprep.subr.bf16.mxu1 %v4693_v49 }
 0x14d   : > { %2106 = vmatpush1.bf16.msra.mxu0 %v4690_v50 }
 0x14e   : > { %4129 = vmatpush3.bf16.msra.mxu1 %v4694_v51  ;;  %2107 = vmatprep.subr.bf16.mxu0 %v4697_v52 }
 0x14f   : > { %4130 = vmatprep.subr.bf16.mxu1 %v4698_v32 }
 0x151   : > { %2108 = vmatpush1.bf16.msra.mxu0 %v4695_v53 }
 0x152   : > { %4131 = vmatpush3.bf16.msra.mxu1 %v4699_v54  ;;  %2109 = vmatprep.subr.bf16.mxu0 %v4702_v55 }
 0x153   : > { %4132 = vmatprep.subr.bf16.mxu1 %v4703_v56 }
 0x155   : > { %2110 = vmatpush1.bf16.msra.mxu0 %v4700_v57 }
 0x156   : > { %4133 = vmatpush3.bf16.msra.mxu1 %v4704_v58  ;;  %2111 = vmatprep.subr.bf16.mxu0 %v4707_v59 }
 0x157   : > { %4134 = vmatprep.subr.bf16.mxu1 %v4708_v61 }
 0x159   : > { %2112 = vmatpush1.bf16.msra.mxu0 %v4705_v60 }
 0x15a   : > { %4135 = vmatpush3.bf16.msra.mxu1 %v4709_v62  ;;  %2113 = vmatprep.subr.bf16.mxu0 %v4712_v63 }
 0x15b   : > { %4246 = vmatprep.subr.bf16.mxu1 %v5111_v40 }
 0x15d   : > { %2114 = vmatpush1.bf16.msra.mxu0 %v4710_v0  ;;  %2212 = vmatmul.mubr.bf16.vlgmr.msra.gmra.mrb[12].mxu1 %v5399_v37 }
 0x15e   : > { %4247 = vmatpush3.bf16.msra.mxu1 %v4713_v2  ;;  %2115 = vmatprep.subr.bf16.mxu0 %v4716_v3 }
 0x15f   : > { %4248 = vmatprep.subr.bf16.mxu1 %v5111_v40  ;;  %4262 = vmatprep.mubr.msk.bf16.mxu1 %vm5112_vm0, %v5111_v40 }
 0x161   : > { %2116 = vmatpush1.bf16.msra.mxu0 %v4714_v4 }
 0x162   : > { %4249 = vmatpush3.bf16.msra.mxu1 %v4717_v5  ;;  %2117 = vmatprep.subr.bf16.mxu0 %v4720_v6 }
 0x163   : > { %4250 = vmatprep.subr.bf16.mxu1 %v5111_v40 }
 0x165   : > { %2118 = vmatpush1.bf16.msra.mxu0 %v4718_v7 }
 0x166   : > { %4251 = vmatpush3.bf16.msra.mxu1 %v4721_v8  ;;  %2119 = vmatprep.subr.bf16.mxu0 %v4724_v10 }
 0x167   : > { %4252 = vmatprep.subr.bf16.mxu1 %v5111_v40 }
 0x169   : > { %2120 = vmatpush1.bf16.msra.mxu0 %v4722_v11 }
 0x16a   : > { %4253 = vmatpush3.bf16.msra.mxu1 %v4725_v12  ;;  %2121 = vmatprep.subr.bf16.mxu0 %v4728_v13 }
 0x16b   : > { %4254 = vmatprep.subr.bf16.mxu1 %v5111_v40 }
 0x16d   : > { %2122 = vmatpush1.bf16.msra.mxu0 %v4726_v14 }
 0x16e   : > { %4255 = vmatpush3.bf16.msra.mxu1 %v4729_v15  ;;  %2123 = vmatprep.subr.bf16.mxu0 %v4732_v16 }
 0x16f   : > { %4256 = vmatprep.subr.bf16.mxu1 %v5111_v40 }
 0x171   : > { %2124 = vmatpush1.bf16.msra.mxu0 %v4730_v17 }
 0x172   : > { %4257 = vmatpush3.bf16.msra.mxu1 %v4733_v18  ;;  %2125 = vmatprep.subr.bf16.mxu0 %v4736_v19 }
 0x173   : > { %4258 = vmatprep.subr.bf16.mxu1 %v5111_v40 }
 0x175   : > { %2126 = vmatpush1.bf16.msra.mxu0 %v4734_v20 }
 0x176   : > { %4259 = vmatpush3.bf16.msra.mxu1 %v4737_v21  ;;  %2127 = vmatprep.subr.bf16.mxu0 %v4740_v22 }
 0x177   : > { %4260 = vmatprep.subr.bf16.mxu1 %v5111_v40 }
 0x179   : > { %2128 = vmatpush1.bf16.msra.mxu0 %v4738_v23 }
 0x17a   : > { %4261 = vmatpush3.bf16.msra.mxu1 %v4741_v24  ;;  %2138 = vmatprep.subr.bf16.mxu0 %v4744_v25 }
 0x17b   : > { %4266 = vmatprep.subr.bf16.mxu1 %v5111_v40 }
 0x17c   : > { %2130 = vmatmul.mubr.bf16.vlgmr.msra.gmra.mrb[12].mxu0 %v5399_v37  ;;  %v4754_v37 = vld [vmem:[#allocation8 + $0x1e0] ss:$12 sps:$4 sm:$0xff]  }
 0x17d   : > { %2139 = vmatpush1.bf16.msra.mxu0 %v4742_v26  ;;  %4263 = vmatmul.mubr.bf16.vlgmr.msra.gmra.mrb[16].mxu1 %v5413_v1 }
 0x17e   : > { %2140 = vmatprep.subr.bf16.mxu0 %v4747_v27  ;;  %2170 = vmatprep.mubr.bf16.mxu0 %v5113_v9 }
 0x17f   : > { %4268 = vmatprep.mubr.msk.bf16.mxu1 %vm5112_vm0, %v5111_v40 }
 0x181   : > { %2141 = vmatpush1.bf16.msra.mxu0 %v4745_v28 }
 0x182   : > { %2142 = vmatprep.subr.bf16.mxu0 %v4750_v29  ;;  %v2259_v29 = vlaneseq }
 0x185   : > { %2143 = vmatpush1.bf16.msra.mxu0 %v4748_v30  ;;  %v5487_v30 = vshrl.u32 %v2259_v29, 7 }
 0x186   : > { %2144 = vmatprep.subr.bf16.mxu0 %v4753_v31  ;;  %v2262_v31 = vand.u32 127, %v2259_v29 }
 0x188   : > { %vm5490_vm3 = vcmp.le.s32.totalorder %v2262_v31, %v5487_v30 }
 0x189   : > { %2145 = vmatpush1.bf16.msra.mxu0 %v4751_v33 }
 0x18a   : > { %2146 = vmatprep.subr.bf16.mxu0 %v4756_v34 }
 0x18d   : > { %2147 = vmatpush1.bf16.msra.mxu0 %v4754_v37 }
 0x18e   : > { %2148 = vmatprep.subr.bf16.mxu0 %v4759_v35 }
 0x18f   : > { %v4074_v39 = vpop.f32.mrb[0].mxu1 }
 0x190   : > { %v4075_v41 = vpop.f32.mrb[1].mxu1 }
 0x191   : > { %2149 = vmatpush1.bf16.msra.mxu0 %v4757_v36  ;;  %v4076_v43 = vadd.f32 %v4075_v41, %v4074_v39  ;;  %v4077_v44 = vpop.f32.mrb[2].mxu1 }
 0x192   : > { %2150 = vmatprep.subr.bf16.mxu0 %v4762_v38  ;;  %v4078_v46 = vpop.f32.mrb[3].mxu1 }
 0x195   : > { %2151 = vmatpush1.bf16.msra.mxu0 %v4760_v42 }
 0x196   : > { %2152 = vmatprep.subr.bf16.mxu0 %v4765_v45 }
 0x199   : > { %2153 = vmatpush1.bf16.msra.mxu0 %v4763_v47 }
 0x19a   : > { %4314 = vmatprep.subr.bf16.mxu0 %v5111_v40 }
 0x19c   : > { %2171 = vmatmul.mubr.bf16.vlgmr.msra.gmra.mrb[12].mxu0 %v5413_v1 }
 0x19d   : > { %4316 = vmatprep.mubr.msk.bf16.mxu0 %vm5112_vm0, %v5111_v40 }
 0x1af   : > { %v969_v48 = vpop.f32.mrb[4].mxu1 }
 0x1b0   : > { %v970_v49 = vadd.f32 %v4076_v43, %v969_v48  ;;  %v4224_v50 = vpop.f32.mrb[5].mxu1 }
 0x1b1   : > { %v972_v51 = vpop.f32.mrb[6].mxu1 }
 0x1b2   : > { %v4225_v52 = vpop.f32.mrb[7].mxu1  ;;  %v5472_v12 = vpack.c.bf16 %v970_v49, %v970_v49 }
 0x1cf   : > { %v888_v32 = vpop.f32.mrb[0].mxu0 }
 0x1d0   : > { %v5459_v53 = vpop.f32.mrb[1].mxu0  ;;  %v2264_v11 = vpack.c.bf16 %v888_v32, %v888_v32 }
 0x1d1   : > { %v892_v54 = vpop.f32.mrb[2].mxu0 }
 0x1d2   : > { %v893_v55 = vpop.f32.mrb[3].mxu0 }
 0x1ef   : > { %v4105_v56 = vpop.f32.mrb[4].mxu0 }
 0x1f0   : > { %v4106_v57 = vpop.f32.mrb[5].mxu0 }
 0x1f1   : > { %v4107_v58 = vadd.f32 %v4106_v57, %v4105_v56  ;;  %v4108_v59 = vpop.f32.mrb[6].mxu0 }
 0x1f2   : > { %v4109_v60 = vpop.f32.mrb[7].mxu0 }
 0x20f   : > { %v1611_v61 = vpop.f32.mrb[8].mxu0 }
 0x210   : > { %v1530_v1 = vpop.f32.mrb[8].mxu1  ;;  %v1612_v62 = vadd.f32 %v4107_v58, %v1611_v61  ;;  %v4244_v63 = vpop.f32.mrb[9].mxu0 }
 0x211   : > { %v2265_v0 = vpack.c.bf16 %v1530_v1, %v1530_v1  ;;  %v5461_v2 = vpop.f32.mrb[9].mxu1  ;;  %v1614_v3 = vpop.f32.mrb[10].mxu0 }
 0x212   : > { %v5463_v4 = vpack.c.bf16 %v1612_v62, %v1612_v62  ;;  %v1534_v5 = vpop.f32.mrb[10].mxu1  ;;  %v4245_v6 = vpop.f32.mrb[11].mxu0 }
 0x213   : > { %v2272_v7 = vsel %vm2267_vm1, %v2265_v0, 0  ;;  %2380 = vrot.lane.b32.xlu1 %v2265_v0, %s5114_s28  ;;  %v1535_v8 = vpop.f32.mrb[11].mxu1 }
 0x214   : > { %v2722_v10 = vsel %vm2267_vm1, %v5463_v4, 0  ;;  %4267 = vmatpush3.bf16.xpose.msra.mxu1 %v2272_v7 }
 0x215   : > { %4315 = vmatpush3.bf16.xpose.msra.mxu0 %v2722_v10  ;;  %4272 = vmatprep.subr.bf16.mxu1 %v5111_v40 }
 0x216   : > { %4326 = vmatprep.subr.bf16.mxu0 %v5111_v40 }
 0x217   : > { %2377 = vrot.lane.b32.xlu1 %v2264_v11, %s5114_s28 }
 0x21b   : > { %4269 = vmatmul.mubr.msk.bf16.vlgmr.msra.gmra.mrb[20].mxu1 %vm2267_vm1, %v2264_v11 }
 0x21c   : > { %4317 = vmatmul.mubr.msk.bf16.vlgmr.msra.gmra.mrb[16].mxu0 %vm2267_vm1, %v5472_v12  ;;  %4274 = vmatprep.mubr.msk.bf16.mxu1 %vm5112_vm0, %v5111_v40 }
 0x21d   : > { %4328 = vmatprep.mubr.msk.bf16.mxu0 %vm5112_vm0, %v5111_v40 }
 0x230   : > { %v4136_v13 = vpop.f32.mrb[12].mxu1 }
 0x231   : > { %v4137_v14 = vpop.f32.mrb[13].mxu1 }
 0x232   : > { %v4138_v15 = vadd.f32 %v4137_v14, %v4136_v13  ;;  %v4139_v16 = vpop.f32.mrb[14].mxu1 }
 0x233   : > { %v4140_v17 = vpop.f32.mrb[15].mxu1 }
 0x250   : > { %v2253_v18 = vpop.f32.mrb[16].mxu1 }
 0x251   : > { %v5481_v19 = vadd.f32 %v4138_v15, %v2253_v18  ;;  %v4264_v20 = vpop.f32.mrb[17].mxu1  ;;  %v2492_v18 = vpack.c.bf16 %v5461_v2, %v5461_v2 }
 0x252   : > { %v2256_v21 = vpop.f32.mrb[18].mxu1 }
 0x253   : > { %v4265_v22 = vpop.f32.mrb[19].mxu1 }
 0x254   : > { %v2498_v22 = vsel %vm2267_vm1, %v2492_v18, 0 }
 0x26f   : > { %v2172_v23 = vpop.f32.mrb[12].mxu0 }
 0x270   : > { %v2266_v24 = vpack.c.bf16 %v2172_v23, %v2172_v23  ;;  %v5483_v25 = vpop.f32.mrb[13].mxu0 }
 0x271   : > { %v2176_v26 = vpop.f32.mrb[14].mxu0  ;;  %v2493_v23 = vpack.c.bf16 %v5483_v25, %v5483_v25 }
 0x272   : > { %v2334_v27 = vsel %vm2332_vm2, %v2266_v24, 0  ;;  %v2177_v28 = vpop.f32.mrb[15].mxu0 }
 0x273   : > { %4273 = vmatpush3.bf16.msra.mxu1 %v2334_v27  ;;  %v2558_v2 = vsel %vm2332_vm2, %v2493_v23, 0 }
 0x274   : > { %4278 = vmatprep.subr.bf16.mxu1 %v5111_v40 }
 0x285   : > { %v2381_v54 = vpop.permute.xlu1 %2380 }
 0x286   : > { %v2386_v56 = vsel %vm2267_vm1, %v2381_v54, 0 }
 0x289   : > { %v2378_v57 = vpop.permute.xlu1 %2377 }
 0x2ee   : > { %v2308_v33 = vpop.f32.mrb[20].mxu1 }
 0x2ef   : > { %v2314_v37 = vmul.f32 0.125, %v2308_v33  ;;  %v4270_v35 = vpop.f32.mrb[21].mxu1  ;;  %v5494_v36 = vpop.f32.mrb[16].mxu0 }
 0x2f0   : > { %v2311_v38 = vpop.f32.mrb[22].mxu1  ;;  %v4318_v39 = vpop.f32.mrb[17].mxu0 }
 0x2f1   : > { %v4271_v41 = vpop.f32.mrb[23].mxu1  ;;  %v2761_v42 = vpop.f32.mrb[18].mxu0  ;;  %v2315_v43 = vsel %vm5490_vm3, %v2314_v37, -1e+30  ;;  %v2764_v39 = vmul.f32 0.125, %v5494_v36 }
 0x2f2   : > { %v2317_v44 = vsel %vm2316_vm4, %v2315_v43, -inf  ;;  %v4319_v45 = vpop.f32.mrb[19].mxu0 }
 0x2f3   : > { %2318 = vmax.xlane.f32.xlu0 %v2317_v44  ;;  %v2765_v41 = vsel %vm5490_vm3, %v2764_v39, -1e+30 }
 0x2f4   : > { %v2766_v42 = vsel %vm2316_vm4, %v2765_v41, -inf }
 0x380   : > { %v2319_v46 = vpop.xlane.xlu0 %2318 }
 0x381   : > { %v2320_v47 = vsub.f32 %v2315_v43, %v2319_v46 }
 0x383   : > { %v2321_v48 = vmul.f32 1.442695, %v2320_v47 }
 0x385   : > { %4862 = vpow2.f32 %v2321_v48 }
 0x38f   : > { %v4863_v49 = vpop.eup %4862 }
 0x390   : > { %v2323_v50 = vsel %vm2316_vm4, %v4863_v49, 0.0 }
 0x391   : > { %2324 = vadd.xlane.f32.xlu0 %v2323_v50 }
 0x41e   : > { %v2325_v51 = vpop.xlane.xlu0 %2324 }
 0x41f   : > { %4864 = vrcp.f32 %v2325_v51 }
 0x429   : > { %v4865_v52 = vpop.eup %4864 }
 0x42a   : > { %v2327_v32 = vmul.f32 %v4865_v52, %v4863_v49 }
 0x42c   : > { %v2328_v55 = vpack.c.bf16 %v2327_v32, %v2327_v32 }
 0x42e   : > { %4275 = vmatmul.mubr.msk.bf16.vlgmr.msra.gmra.mrb[24].mxu1 %vm2316_vm4, %v2328_v55 }
 0x42f   : > { %4279 = vmatpush3.bf16.xpose.msra.mxu1 %v2386_v56  ;;  %4280 = vmatprep.mubr.msk.bf16.mxu1 %vm5112_vm0, %v5111_v40 }
 0x430   : > { %4284 = vmatprep.subr.bf16.mxu1 %v5111_v40 }
 0x436   : > { %4281 = vmatmul.mubr.msk.bf16.vlgmr.msra.gmra.mrb[28].mxu1 %vm2267_vm1, %v2378_v57 }
 0x437   : > { %4286 = vmatprep.mubr.msk.bf16.mxu1 %vm5112_vm0, %v5111_v40 }
 0x501   : > { %v5508_v58 = vpop.f32.mrb[24].mxu1 }
 0x502   : > { %v4276_v59 = vpop.f32.mrb[25].mxu1 }
 0x503   : > { %v2373_v60 = vpop.f32.mrb[26].mxu1 }
 0x504   : > { %v4277_v61 = vpop.f32.mrb[27].mxu1 }
 0x509   : > { %v2422_v1 = vpop.f32.mrb[28].mxu1 }
 0x50a   : > { %v2428_v62 = vmul.f32 0.125, %v2422_v1  ;;  %v4282_v63 = vpop.f32.mrb[29].mxu1 }
 0x50b   : > { %v2425_v0 = vpop.f32.mrb[30].mxu1 }
 0x50c   : > { %v4283_v3 = vpop.f32.mrb[31].mxu1  ;;  %v2429_v5 = vsel %vm5490_vm3, %v2428_v62, -1e+30 }
 0x50d   : > { %v2430_v6 = vsel %vm2316_vm4, %v2429_v5, -inf }
 0x50e   : > { %2431 = vmax.xlane.f32.xlu0 %v2430_v6 }
 0x524   : > { %2443 = vrot.lane.b32.xlu0 %v2266_v24, %s5114_s28  ;;  %v2491_v24 = vpack.c.bf16 %v5459_v53, %v5459_v53 }
 0x59b   : > { %v2432_v7 = vpop.xlane.xlu0 %2431 }
 0x59c   : > { %v2433_v8 = vsub.f32 %v2429_v5, %v2432_v7 }
 0x59e   : > { %v2434_v10 = vmul.f32 1.442695, %v2433_v8 }
 0x59f   : > { %v2444_v11 = vpop.permute.xlu0 %2443 }
 0x5a0   : > { %4866 = vpow2.f32 %v2434_v10  ;;  %v2449_v13 = vsel %vm2332_vm2, %v2444_v11, 0 }
 0x5a1   : > { %4285 = vmatpush3.bf16.msra.mxu1 %v2449_v13 }
 0x5a2   : > { %4290 = vmatprep.subr.bf16.mxu1 %v5111_v40 }
 0x5aa   : > { %v4867_v14 = vpop.eup %4866 }
 0x5ab   : > { %v2436_v15 = vsel %vm2316_vm4, %v4867_v14, 0.0 }
 0x5ac   : > { %2437 = vadd.xlane.f32.xlu1 %v2436_v15 }
 0x639   : > { %v2438_v16 = vpop.xlane.xlu1 %2437 }
 0x63a   : > { %4868 = vrcp.f32 %v2438_v16 }
 0x644   : > { %v4869_v17 = vpop.eup %4868 }
 0x645   : > { %v2440_v20 = vmul.f32 %v4869_v17, %v4867_v14 }
 0x647   : > { %v2441_v21 = vpack.c.bf16 %v2440_v20, %v2440_v20 }
 0x649   : > { %4287 = vmatmul.mubr.msk.bf16.vlgmr.msra.gmra.mrb[32].mxu1 %vm2316_vm4, %v2441_v21 }
 0x64a   : > { %4291 = vmatpush3.bf16.xpose.msra.mxu1 %v2498_v22  ;;  %4292 = vmatprep.mubr.msk.bf16.mxu1 %vm5112_vm0, %v5111_v40 }
 0x64b   : > { %4296 = vmatprep.subr.bf16.mxu1 %v5111_v40 }
 0x651   : > { %4293 = vmatmul.mubr.msk.bf16.vlgmr.msra.gmra.mrb[36].mxu1 %vm2267_vm1, %v2491_v24 }
 0x652   : > { %4297 = vmatpush3.bf16.msra.mxu1 %v2558_v2  ;;  %4298 = vmatprep.mubr.msk.bf16.mxu1 %vm5112_vm0, %v5111_v40 }
 0x653   : > { %4302 = vmatprep.subr.bf16.mxu1 %v5111_v40 }
 0x71c   : > { %v5533_v26 = vpop.f32.mrb[32].mxu1 }
 0x71d   : > { %v4288_v27 = vpop.f32.mrb[33].mxu1 }
 0x71e   : > { %v2488_v28 = vpop.f32.mrb[34].mxu1 }
 0x71f   : > { %v4289_v29 = vpop.f32.mrb[35].mxu1 }
 0x724   : > { %v2534_v31 = vpop.f32.mrb[36].mxu1 }
 0x725   : > { %v2540_v25 = vmul.f32 0.125, %v2534_v31  ;;  %v4294_v33 = vpop.f32.mrb[37].mxu1 }
 0x726   : > { %v2537_v37 = vpop.f32.mrb[38].mxu1  ;;  %v2717_v33 = vpack.c.bf16 %v5481_v19, %v5481_v19 }
 0x727   : > { %v4295_v53 = vpop.f32.mrb[39].mxu1  ;;  %v2541_v35 = vsel %vm5490_vm3, %v2540_v25, -1e+30 }
 0x728   : > { %v2542_v38 = vsel %vm2316_vm4, %v2541_v35, -inf }
 0x729   : > { %2543 = vmax.xlane.f32.xlu0 %v2542_v38 }
 0x73f   : > { %2601 = vrot.lane.b32.xlu0 %v2491_v24, %s5114_s28 }
 0x75e   : > { %2767 = vmax.xlane.f32.xlu0 %v2766_v42 }
 0x774   : > { %2667 = vrot.lane.b32.xlu0 %v2493_v23, %s5114_s28 }
 0x7b6   : > { %v2544_v43 = vpop.xlane.xlu0 %2543 }
 0x7b7   : > { %v2545_v44 = vsub.f32 %v2541_v35, %v2544_v43  ;;  %v2782_v43 = vsel %vm2332_vm2, %v2717_v33, 0 }
 0x7b9   : > { %v2546_v45 = vmul.f32 1.442695, %v2545_v44 }
 0x7ba   : > { %v2602_v52 = vpop.permute.xlu0 %2601 }
 0x7bb   : > { %4870 = vpow2.f32 %v2546_v45 }
 0x7c5   : > { %v4871_v46 = vpop.eup %4870 }
 0x7c6   : > { %v2548_v47 = vsel %vm2316_vm4, %v4871_v46, 0.0 }
 0x7c7   : > { %2549 = vadd.xlane.f32.xlu1 %v2548_v47 }
 0x7d8   : > { %2604 = vrot.lane.b32.xlu1 %v2492_v18, %s5114_s28 }
 0x7dc   : > { %2828 = vrot.lane.b32.xlu1 %v5463_v4, %s5114_s28 }
 0x7e0   : > { %2825 = vrot.lane.b32.xlu1 %v5472_v12, %s5114_s28 }
 0x7eb   : > { %v2768_v55 = vpop.xlane.xlu0 %2767 }
 0x7ec   : > { %v2769_v17 = vsub.f32 %v2765_v41, %v2768_v55  ;;  %v4794_v55 = vld [vmem:[#allocation10 + $0x8] ss:$12 sps:$4 sm:$0xff]  }
 0x7ee   : > { %v2770_v21 = vmul.f32 1.442695, %v2769_v17  ;;  %v4787_v17 = vld [vmem:[#allocation10 + $0xa8] ss:$12 sps:$4 sm:$0xff]  }
 0x7ef   : > { %v2668_v4 = vpop.permute.xlu0 %2667 }
 0x7f0   : > { %v2673_v12 = vsel %vm2332_vm2, %v2668_v4, 0  ;;  %v4777_v4 = vld [vmem:[#allocation10 + $0x4c] ss:$12 sps:$4 sm:$0xff]  }
 0x854   : > { %v2550_v36 = vpop.xlane.xlu1 %2549 }
 0x855   : > { %4872 = vrcp.f32 %v2550_v36 }
 0x858   : > { %v2605_v48 = vpop.permute.xlu1 %2604 }
 0x859   : > { %v2610_v56 = vsel %vm2267_vm1, %v2605_v48, 0 }
 0x85c   : > { %v2829_v49 = vpop.permute.xlu1 %2828 }
 0x85d   : > { %v2834_v50 = vsel %vm2267_vm1, %v2829_v49, 0  ;;  %v4766_v49 = vld [vmem:[#allocation10] ss:$12 sps:$4 sm:$0xff]  }
 0x85e   : > { %4327 = vmatpush3.bf16.xpose.msra.mxu0 %v2834_v50  ;;  %v4768_v50 = vld [vmem:[#allocation10 + $0x4] ss:$12 sps:$4 sm:$0xff]  }
 0x85f   : > { %v4873_v51 = vpop.eup %4872  ;;  %3454 = vmatprep.subr.bf16.mxu0 %v4768_v50 }
 0x860   : > { %v2552_v32 = vmul.f32 %v4873_v51, %v4871_v46  ;;  %v2826_v57 = vpop.permute.xlu1 %2825  ;;  %v4771_v51 = vld [vmem:[#allocation10 + $0x1c] ss:$12 sps:$4 sm:$0xff]  }
 0x862   : > { %v2553_v54 = vpack.c.bf16 %v2552_v32, %v2552_v32  ;;  %v4774_v32 = vld [vmem:[#allocation10 + $0x34] ss:$12 sps:$4 sm:$0xff]  }
 0x864   : > { %4299 = vmatmul.mubr.msk.bf16.vlgmr.msra.gmra.mrb[40].mxu1 %vm2316_vm4, %v2553_v54  ;;  %v4793_v54 = vld [vmem:[#allocation10 + $0xc8] ss:$12 sps:$4 sm:$0xff]  }
 0x865   : > { %4303 = vmatpush3.bf16.xpose.msra.mxu1 %v2610_v56  ;;  %4329 = vmatmul.mubr.msk.bf16.vlgmr.msra.gmra.mrb[20].mxu0 %vm2267_vm1, %v2826_v57  ;;  %v4772_v56 = vld [vmem:[#allocation10 + $0x30] ss:$12 sps:$4 sm:$0xff]   ;;  %v4798_v57 = vld [vmem:[#allocation10 + $0xe0] ss:$12 sps:$4 sm:$0xff]  }
 0x866   : > { %4304 = vmatprep.mubr.msk.bf16.mxu1 %vm5112_vm0, %v5111_v40  ;;  %4308 = vmatprep.subr.bf16.mxu1 %v5111_v40 }
 0x867   : > { %3455 = vmatpush1.bf16.msra.mxu0 %v4766_v49 }
 0x868   : > { %3456 = vmatprep.subr.bf16.mxu0 %v4771_v51 }
 0x86c   : > { %4305 = vmatmul.mubr.msk.bf16.vlgmr.msra.gmra.mrb[44].mxu1 %vm2267_vm1, %v2602_v52  ;;  %v4769_v52 = vld [vmem:[#allocation10 + $0x18] ss:$12 sps:$4 sm:$0xff]  }
 0x86d   : > { %4309 = vmatpush3.bf16.msra.mxu1 %v2673_v12  ;;  %4310 = vmatprep.mubr.msk.bf16.mxu1 %vm5112_vm0, %v5111_v40  ;;  %v4799_v12 = vld [vmem:[#allocation10 + $0x20] ss:$12 sps:$4 sm:$0xff]  }
 0x86e   : > { %4320 = vmatprep.subr.bf16.mxu1 %v5111_v40  ;;  %3457 = vmatpush1.bf16.msra.mxu0 %v4769_v52 }
 0x86f   : > { %3458 = vmatprep.subr.bf16.mxu0 %v4774_v32 }
 0x872   : > { %3459 = vmatpush1.bf16.msra.mxu0 %v4772_v56 }
 0x873   : > { %3460 = vmatprep.subr.bf16.mxu0 %v4777_v4 }
 0x937   : > { %v5562_v59 = vpop.f32.mrb[40].mxu1 }
 0x938   : > { %v4300_v60 = vpop.f32.mrb[41].mxu1  ;;  %v2870_v61 = vpop.f32.mrb[20].mxu0 }
 0x939   : > { %v2597_v1 = vpop.f32.mrb[42].mxu1  ;;  %v4330_v62 = vpop.f32.mrb[21].mxu0  ;;  %v2876_v6 = vmul.f32 0.125, %v2870_v61  ;;  %v4803_v60 = vld [vmem:[#allocation10 + $0xf8] ss:$12 sps:$4 sm:$0xff]  }
 0x93a   : > { %v4301_v63 = vpop.f32.mrb[43].mxu1  ;;  %v2873_v0 = vpop.f32.mrb[22].mxu0  ;;  %v4775_v61 = vld [vmem:[#allocation10 + $0x48] ss:$12 sps:$4 sm:$0xff]   ;;  %v4780_v1 = vld [vmem:[#allocation10 + $0x64] ss:$12 sps:$4 sm:$0xff]  }
 0x93b   : > { %v4331_v3 = vpop.f32.mrb[23].mxu0  ;;  %v2877_v15 = vsel %vm5490_vm3, %v2876_v6, -1e+30  ;;  %v4804_v62 = vld [vmem:[#allocation10 + $0x38] ss:$12 sps:$4 sm:$0xff]   ;;  %3461 = vmatpush1.bf16.msra.mxu0 %v4775_v61 }
 0x93c   : > { %v2878_v16 = vsel %vm2316_vm4, %v2877_v15, -inf  ;;  %v4808_v63 = vld [vmem:[#allocation10 + $0x110] ss:$12 sps:$4 sm:$0xff]   ;;  %v4778_v0 = vld [vmem:[#allocation10 + $0x60] ss:$12 sps:$4 sm:$0xff]   ;;  %3462 = vmatprep.subr.bf16.mxu0 %v4780_v1 }
 0x93d   : > { %v4783_v3 = vld [vmem:[#allocation10 + $0x7c] ss:$12 sps:$4 sm:$0xff]   ;;  %v4834_v1 = vld [vmem:[#allocation10 + $0x198] ss:$12 sps:$4 sm:$0xff]  }
 0x93e   : > { %v4813_v6 = vld [vmem:[#allocation10 + $0x128] ss:$12 sps:$4 sm:$0xff]  }
 0x93f   : > { %v2646_v5 = vpop.f32.mrb[44].mxu1  ;;  %3463 = vmatpush1.bf16.msra.mxu0 %v4778_v0  ;;  %v4836_v61 = vld [vmem:[#allocation10 + $0x19c] ss:$12 sps:$4 sm:$0xff]   ;;  %v4844_v0 = vld [vmem:[#allocation10 + $0x1cc] ss:$12 sps:$4 sm:$0xff]  }
 0x940   : > { %v2652_v7 = vmul.f32 0.125, %v2646_v5  ;;  %v4306_v8 = vpop.f32.mrb[45].mxu1  ;;  %v4809_v5 = vld [vmem:[#allocation10 + $0x50] ss:$12 sps:$4 sm:$0xff]   ;;  %3464 = vmatprep.subr.bf16.mxu0 %v4783_v3  ;;  %v4842_v3 = vld [vmem:[#allocation10 + $0x1c8] ss:$12 sps:$4 sm:$0xff]  }
 0x941   : > { %v2649_v10 = vpop.f32.mrb[46].mxu1  ;;  %v4786_v8 = vld [vmem:[#allocation10 + $0x94] ss:$12 sps:$4 sm:$0xff]  }
 0x942   : > { %v4307_v11 = vpop.f32.mrb[47].mxu1  ;;  %v2653_v13 = vsel %vm5490_vm3, %v2652_v7, -1e+30  ;;  %v4781_v7 = vld [vmem:[#allocation10 + $0x78] ss:$12 sps:$4 sm:$0xff]  }
 0x943   : > { %v2654_v14 = vsel %vm2316_vm4, %v2653_v13, -inf  ;;  %v4814_v10 = vld [vmem:[#allocation10 + $0x68] ss:$12 sps:$4 sm:$0xff]   ;;  %v4818_v11 = vld [vmem:[#allocation10 + $0x140] ss:$12 sps:$4 sm:$0xff]   ;;  %3465 = vmatpush1.bf16.msra.mxu0 %v4781_v7 }
 0x944   : > { %2655 = vmax.xlane.f32.xlu1 %v2654_v14  ;;  %3466 = vmatprep.subr.bf16.mxu0 %v4786_v8  ;;  %v4789_v14 = vld [vmem:[#allocation10 + $0xac] ss:$12 sps:$4 sm:$0xff]   ;;  %v4849_v7 = vld [vmem:[#allocation10 + $0x1e8] ss:$12 sps:$4 sm:$0xff]  }
 0x945   : > { %v4852_v8 = vld [vmem:[#allocation10 + $0x1fc] ss:$12 sps:$4 sm:$0xff]  }
 0x948   : > { %2879 = vmax.xlane.f32.xlu1 %v2878_v16  ;;  %v4823_v16 = vld [vmem:[#allocation10 + $0x158] ss:$12 sps:$4 sm:$0xff]  }
 0x9d1   : > { %v2656_v18 = vpop.xlane.xlu1 %2655 }
 0x9d2   : > { %v2657_v20 = vsub.f32 %v2653_v13, %v2656_v18  ;;  %v4784_v13 = vld [vmem:[#allocation10 + $0x90] ss:$12 sps:$4 sm:$0xff]  }
 0x9d3   : > { %3467 = vmatpush1.bf16.msra.mxu0 %v4784_v13  ;;  %v4792_v18 = vld [vmem:[#allocation10 + $0xc4] ss:$12 sps:$4 sm:$0xff]   ;;  %v4856_v13 = vld [vmem:[#allocation10 + $0x214] ss:$12 sps:$4 sm:$0xff]  }
 0x9d4   : > { %v2658_v22 = vmul.f32 1.442695, %v2657_v20  ;;  %3468 = vmatprep.subr.bf16.mxu0 %v4789_v14  ;;  %v4824_v20 = vld [vmem:[#allocation10 + $0x98] ss:$12 sps:$4 sm:$0xff]   ;;  %v4854_v14 = vld [vmem:[#allocation10 + $0x210] ss:$12 sps:$4 sm:$0xff]  }
 0x9d5   : > { %v2880_v23 = vpop.xlane.xlu1 %2879 }
 0x9d6   : > { %4874 = vpow2.f32 %v2658_v22  ;;  %v2881_v24 = vsub.f32 %v2877_v15, %v2880_v23  ;;  %v4819_v15 = vld [vmem:[#allocation10 + $0x80] ss:$12 sps:$4 sm:$0xff]   ;;  %v4797_v22 = vld [vmem:[#allocation10 + $0xdc] ss:$12 sps:$4 sm:$0xff]   ;;  %v4795_v23 = vld [vmem:[#allocation10 + $0xd8] ss:$12 sps:$4 sm:$0xff]  }
 0x9d7   : > { %4876 = vpow2.f32 %v2770_v21  ;;  %3469 = vmatpush1.bf16.msra.mxu0 %v4787_v17  ;;  %v4790_v21 = vld [vmem:[#allocation10 + $0xc0] ss:$12 sps:$4 sm:$0xff]  }
 0x9d8   : > { %v2882_v2 = vmul.f32 1.442695, %v2881_v24  ;;  %3470 = vmatprep.subr.bf16.mxu0 %v4792_v18  ;;  %v4802_v24 = vld [vmem:[#allocation10 + $0xf4] ss:$12 sps:$4 sm:$0xff]  }
 0x9d9   : > { %v4858_v18 = vld [vmem:[#allocation10 + $0x228] ss:$12 sps:$4 sm:$0xff]  }
 0x9da   : > { %4878 = vpow2.f32 %v2882_v2  ;;  %v4800_v2 = vld [vmem:[#allocation10 + $0xf0] ss:$12 sps:$4 sm:$0xff]  }
 0x9db   : > { %3471 = vmatpush1.bf16.msra.mxu0 %v4790_v21 }
 0x9dc   : > { %3472 = vmatprep.subr.bf16.mxu0 %v4797_v22 }
 0x9df   : > { %3473 = vmatpush1.bf16.msra.mxu0 %v4795_v23 }
 0x9e0   : > { %v4875_v27 = vpop.eup %4874  ;;  %3474 = vmatprep.subr.bf16.mxu0 %v4802_v24 }
 0x9e1   : > { %v2660_v28 = vsel %vm2316_vm4, %v4875_v27, 0.0  ;;  %v4877_v29 = vpop.eup %4876 }
 0x9e2   : > { %2661 = vadd.xlane.f32.xlu1 %v2660_v28  ;;  %v2772_v34 = vsel %vm2316_vm4, %v4877_v29, 0.0  ;;  %v4805_v28 = vld [vmem:[#allocation10 + $0x108] ss:$12 sps:$4 sm:$0xff]  }
 0x9e3   : > { %3475 = vmatpush1.bf16.msra.mxu0 %v4800_v2 }
 0x9e4   : > { %v4879_v31 = vpop.eup %4878 }
 0x9e5   : > { %v2884_v25 = vsel %vm2316_vm4, %v4879_v31, 0.0 }
 0x9e6   : > { %2773 = vadd.xlane.f32.xlu1 %v2772_v34  ;;  %v4810_v34 = vld [vmem:[#allocation10 + $0x120] ss:$12 sps:$4 sm:$0xff]  }
 0x9ea   : > { %2885 = vadd.xlane.f32.xlu1 %v2884_v25  ;;  %v4815_v25 = vld [vmem:[#allocation10 + $0x138] ss:$12 sps:$4 sm:$0xff]  }
 0x9fb   : > { %2891 = vrot.lane.b32.xlu1 %v2717_v33, %s5114_s28  ;;  %v4822_v33 = vld [vmem:[#allocation10 + $0x154] ss:$12 sps:$4 sm:$0xff]  }
 0xa6f   : > { %v2662_v37 = vpop.xlane.xlu1 %2661 }
 0xa70   : > { %4880 = vrcp.f32 %v2662_v37  ;;  %v4820_v37 = vld [vmem:[#allocation10 + $0x150] ss:$12 sps:$4 sm:$0xff]  }
 0xa73   : > { %v2774_v53 = vpop.xlane.xlu1 %2773 }
 0xa74   : > { %4882 = vrcp.f32 %v2774_v53  ;;  %v4827_v53 = vld [vmem:[#allocation10 + $0x16c] ss:$12 sps:$4 sm:$0xff]  }
 0xa77   : > { %v2886_v35 = vpop.xlane.xlu1 %2885 }
 0xa78   : > { %4884 = vrcp.f32 %v2886_v35  ;;  %v4828_v35 = vld [vmem:[#allocation10 + $0x170] ss:$12 sps:$4 sm:$0xff]  }
 0xa7a   : > { %v4881_v38 = vpop.eup %4880 }
 0xa7b   : > { %v2664_v39 = vmul.f32 %v4881_v38, %v4875_v27  ;;  %v2892_v44 = vpop.permute.xlu1 %2891  ;;  %v4807_v27 = vld [vmem:[#allocation10 + $0x10c] ss:$12 sps:$4 sm:$0xff]   ;;  %v4825_v38 = vld [vmem:[#allocation10 + $0x168] ss:$12 sps:$4 sm:$0xff]  }
 0xa7c   : > { %v2897_v47 = vsel %vm2332_vm2, %v2892_v44, 0  ;;  %3476 = vmatprep.subr.bf16.mxu0 %v4807_v27 }
 0xa7d   : > { %v2665_v41 = vpack.c.bf16 %v2664_v39, %v2664_v39  ;;  %3477 = vmatpush1.bf16.msra.mxu0 %v4805_v28  ;;  %v4829_v39 = vld [vmem:[#allocation10 + $0xb0] ss:$12 sps:$4 sm:$0xff]  }
 0xa7e   : > { %v4883_v42 = vpop.eup %4882 }
 0xa7f   : > { %4311 = vmatmul.mubr.msk.bf16.vlgmr.msra.gmra.mrb[48].mxu1 %vm2316_vm4, %v2665_v41  ;;  %v2776_v19 = vmul.f32 %v4883_v42, %v4877_v29  ;;  %v4812_v29 = vld [vmem:[#allocation10 + $0x124] ss:$12 sps:$4 sm:$0xff]  }
 0xa80   : > { %4321 = vmatpush3.bf16.msra.mxu1 %v2782_v43  ;;  %4322 = vmatprep.mubr.msk.bf16.mxu1 %vm5112_vm0, %v5111_v40  ;;  %v4832_v41 = vld [vmem:[#allocation10 + $0x184] ss:$12 sps:$4 sm:$0xff]  }
 0xa81   : > { %4332 = vmatprep.subr.bf16.mxu1 %v5111_v40  ;;  %v2777_v45 = vpack.c.bf16 %v2776_v19, %v2776_v19  ;;  %3478 = vmatprep.subr.bf16.mxu0 %v4812_v29  ;;  %v3065_v29 = vsub.s32 2, %v5487_v30 }
 0xa82   : > { %v4885_v46 = vpop.eup %4884  ;;  %3479 = vmatpush1.bf16.msra.mxu0 %v4810_v34  ;;  %v3057_v34 = vsub.s32 0, %v5487_v30 }
 0xa83   : > { %v2888_v36 = vmul.f32 %v4885_v46, %v4879_v31  ;;  %v4817_v31 = vld [vmem:[#allocation10 + $0x13c] ss:$12 sps:$4 sm:$0xff]  }
 0xa84   : > { %3480 = vmatprep.subr.bf16.mxu0 %v4817_v31  ;;  %v3061_v31 = vsub.s32 1, %v5487_v30 }
 0xa85   : > { %v2889_v48 = vpack.c.bf16 %v2888_v36, %v2888_v36 }
 0xa86   : > { %3481 = vmatpush1.bf16.msra.mxu0 %v4815_v25 }
 0xa87   : > { %4323 = vmatmul.mubr.msk.bf16.vlgmr.msra.gmra.mrb[52].mxu1 %vm2316_vm4, %v2777_v45  ;;  %3482 = vmatprep.subr.bf16.mxu0 %v4822_v33 }
 0xa88   : > { %4333 = vmatpush3.bf16.msra.mxu1 %v2897_v47  ;;  %4334 = vmatprep.mubr.msk.bf16.mxu1 %vm5112_vm0, %v5111_v40 }
 0xa89   : > { %4175 = vmatprep.subr.bf16.mxu1 %v4793_v54 }
 0xa8a   : > { %3483 = vmatpush1.bf16.msra.mxu0 %v4820_v37 }
 0xa8b   : > { %3484 = vmatprep.subr.bf16.mxu0 %v4827_v53 }
 0xa8e   : > { %3485 = vmatpush1.bf16.msra.mxu0 %v4825_v38 }
 0xa8f   : > { %4335 = vmatmul.mubr.msk.bf16.vlgmr.msra.gmra.mrb[56].mxu1 %vm2316_vm4, %v2889_v48  ;;  %3495 = vmatprep.subr.bf16.mxu0 %v4832_v41 }
 0xa90   : > { %4176 = vmatpush3.bf16.msra.mxu1 %v4794_v55 }
 0xa91   : > { %4177 = vmatprep.subr.bf16.mxu1 %v4798_v57 }
 0xa94   : > { %4178 = vmatpush3.bf16.msra.mxu1 %v4799_v12  ;;  %v4830_v12 = vld [vmem:[#allocation10 + $0x180] ss:$12 sps:$4 sm:$0xff]  }
 0xa95   : > { %4179 = vmatprep.subr.bf16.mxu1 %v4803_v60  ;;  %v4833_v60 = vld [vmem:[#allocation10 + $0x188] ss:$12 sps:$4 sm:$0xff]  }
 0xa98   : > { %4180 = vmatpush3.bf16.msra.mxu1 %v4804_v62  ;;  %v4837_v62 = vld [vmem:[#allocation10 + $0x1a0] ss:$12 sps:$4 sm:$0xff]  }
 0xa99   : > { %4181 = vmatprep.subr.bf16.mxu1 %v4808_v63  ;;  %v4841_v63 = vld [vmem:[#allocation10 + $0x1b8] ss:$12 sps:$4 sm:$0xff]  }
 0xa9c   : > { %4182 = vmatpush3.bf16.msra.mxu1 %v4809_v5  ;;  %v4845_v5 = vld [vmem:[#allocation10 + $0x1d0] ss:$12 sps:$4 sm:$0xff]  }
 0xa9d   : > { %4183 = vmatprep.subr.bf16.mxu1 %v4813_v6  ;;  %v4848_v6 = vld [vmem:[#allocation10 + $0x1e4] ss:$12 sps:$4 sm:$0xff]  }
 0xaa0   : > { %4184 = vmatpush3.bf16.msra.mxu1 %v4814_v10  ;;  %v4850_v10 = vld [vmem:[#allocation10 + $0x1f8] ss:$12 sps:$4 sm:$0xff]  }
 0xaa1   : > { %4185 = vmatprep.subr.bf16.mxu1 %v4818_v11  ;;  %v4853_v11 = vld [vmem:[#allocation10 + $0x200] ss:$12 sps:$4 sm:$0xff]  }
 0xaa4   : > { %4186 = vmatpush3.bf16.msra.mxu1 %v4819_v15  ;;  %v4857_v15 = vld [vmem:[#allocation10 + $0x218] ss:$12 sps:$4 sm:$0xff]  }
 0xaa5   : > { %4187 = vmatprep.subr.bf16.mxu1 %v4823_v16  ;;  %v4860_v16 = vld [vmem:[#allocation10 + $0x22c] ss:$12 sps:$4 sm:$0xff]  }
 0xaa8   : > { %4188 = vmatpush3.bf16.msra.mxu1 %v4824_v20  ;;  %v4861_v20 = vld [vmem:[#allocation10 + $0x230] ss:$12 sps:$4 sm:$0xff]  }
 0xaa9   : > { %4189 = vmatprep.subr.bf16.mxu1 %v4828_v35 }
 0xaac   : > { %4190 = vmatpush3.bf16.msra.mxu1 %v4829_v39 }
 0xaad   : > { %4338 = vmatprep.subr.bf16.mxu1 %v5111_v40 }
 0xb52   : > { %v2709_v42 = vpop.f32.mrb[48].mxu1 }
 0xb53   : > { %v4473_v43 = vpack.i.bf16 %v5533_v26, %v2709_v42  ;;  %v4312_v19 = vpop.f32.mrb[49].mxu1 }
 0xb54   : > { %v2712_v44 = vpop.f32.mrb[50].mxu1 }
 0xb55   : > { %4474 = vrot.lane.b32.xlu0 %v4473_v43, %s5114_s28  ;;  %v4313_v45 = vpop.f32.mrb[51].mxu1 }
 0xb5a   : > { %v5589_v46 = vpop.f32.mrb[52].mxu1 }
 0xb5b   : > { %v4324_v47 = vpop.f32.mrb[53].mxu1 }
 0xb5c   : > { %v2821_v36 = vpop.f32.mrb[54].mxu1 }
 0xb5d   : > { %v4325_v48 = vpop.f32.mrb[55].mxu1 }
 0xb62   : > { %v2933_v49 = vpop.f32.mrb[56].mxu1 }
 0xb63   : > { %2948 = vrot.lane.b32.xlu1 %v2933_v49, %s5114_s28  ;;  %v4336_v50 = vpop.f32.mrb[57].mxu1 }
 0xb64   : > { %v2936_v51 = vpop.f32.mrb[58].mxu1 }
 0xb65   : > { %v4337_v52 = vpop.f32.mrb[59].mxu1 }
 0xbc7   : > { %v4475_v32 = vpop.permute.xlu0 %4474 }
 0xbc8   : > { %v4477_v54 = vunpack.i.h.bf16 %v4475_v32  ;;  %v4476_v55 = vunpack.i.l.bf16 %v4475_v32 }
 0xbca   : > { %v2951_v26 = vsel %vm2267_vm1, %v5508_v58, %v4477_v54  ;;  %v2952_v56 = vsel %vm2267_vm1, %v5562_v59, %v4476_v55  ;;  %v4840_v58 = vld [vmem:[#allocation10 + $0x1b4] ss:$12 sps:$4 sm:$0xff]   ;;  %v4838_v59 = vld [vmem:[#allocation10 + $0x1b0] ss:$12 sps:$4 sm:$0xff]  }
 0xbcb   : > { %v2954_v57 = vpack.c.bf16 %v2951_v26, %v2951_v26  ;;  %v2955_v4 = vpack.c.bf16 %v2952_v56, %v2952_v56 }
 0xbcd   : > { %3486 = vmatprep.mubr.bf16.mxu0 %v2955_v4  ;;  %3568 = vmatprep.mubr.bf16.mxu1 %v2955_v4 }
 0xbce   : > { %3487 = vmatmul.mubr.bf16.vlgmr.msra.gmra.mrb[24].mxu0 %v2954_v57  ;;  %3569 = vmatmul.mubr.bf16.vlgmr.msra.gmra.mrb[60].mxu1 %v2954_v57 }
 0xbcf   : > { %3496 = vmatpush1.bf16.msra.mxu0 %v4830_v12  ;;  %4339 = vmatpush3.bf16.msra.mxu1 %v4833_v60 }
 0xbd0   : > { %3497 = vmatprep.subr.bf16.mxu0 %v4836_v61  ;;  %4340 = vmatprep.subr.bf16.mxu1 %v5111_v40 }
 0xbd1   : > { %3527 = vmatprep.mubr.bf16.mxu0 %v5113_v9  ;;  %4354 = vmatprep.mubr.msk.bf16.mxu1 %vm5112_vm0, %v5111_v40  ;;  %v4846_v9 = vld [vmem:[#allocation10 + $0x1e0] ss:$12 sps:$4 sm:$0xff]  }
 0xbd3   : > { %3498 = vmatpush1.bf16.msra.mxu0 %v4834_v1  ;;  %4341 = vmatpush3.bf16.msra.mxu1 %v4837_v62 }
 0xbd4   : > { %3499 = vmatprep.subr.bf16.mxu0 %v4840_v58  ;;  %4342 = vmatprep.subr.bf16.mxu1 %v5111_v40 }
 0xbd5   : > { %v2949_v17 = vpop.permute.xlu1 %2948 }
 0xbd6   : > { %v2953_v21 = vsel %vm2267_vm1, %v5589_v46, %v2949_v17 }
 0xbd7   : > { %3500 = vmatpush1.bf16.msra.mxu0 %v4838_v59  ;;  %4343 = vmatpush3.bf16.msra.mxu1 %v4841_v63  ;;  %v2956_v22 = vpack.c.bf16 %v2953_v21, %v2953_v21 }
 0xbd8   : > { %3501 = vmatprep.subr.bf16.mxu0 %v4844_v0  ;;  %4344 = vmatprep.subr.bf16.mxu1 %v5111_v40 }
 0xbdb   : > { %3502 = vmatpush1.bf16.msra.mxu0 %v4842_v3  ;;  %4345 = vmatpush3.bf16.msra.mxu1 %v4845_v5 }
 0xbdc   : > { %3503 = vmatprep.subr.bf16.mxu0 %v4848_v6  ;;  %4346 = vmatprep.subr.bf16.mxu1 %v5111_v40 }
 0xbdf   : > { %3504 = vmatpush1.bf16.msra.mxu0 %v4846_v9  ;;  %4347 = vmatpush3.bf16.msra.mxu1 %v4849_v7 }
 0xbe0   : > { %3505 = vmatprep.subr.bf16.mxu0 %v4852_v8  ;;  %4348 = vmatprep.subr.bf16.mxu1 %v5111_v40 }
 0xbe3   : > { %3506 = vmatpush1.bf16.msra.mxu0 %v4850_v10  ;;  %4349 = vmatpush3.bf16.msra.mxu1 %v4853_v11 }
 0xbe4   : > { %3507 = vmatprep.subr.bf16.mxu0 %v4856_v13  ;;  %4350 = vmatprep.subr.bf16.mxu1 %v5111_v40 }
 0xbe7   : > { %3508 = vmatpush1.bf16.msra.mxu0 %v4854_v14  ;;  %4351 = vmatpush3.bf16.msra.mxu1 %v4857_v15 }
 0xbe8   : > { %3509 = vmatprep.subr.bf16.mxu0 %v4860_v16  ;;  %4352 = vmatprep.subr.bf16.mxu1 %v5111_v40  ;;  %v3053_v40 = vld [vmem:[%s5669_s5] sm:$0x7] }
 0xbe9   : > { %v3066_v25 = vrot.slane %v3053_v40, %v3065_v29  ;;  %v3058_v33 = vrot.slane %v3053_v40, %v3057_v34  ;;  %v3062_v37 = vrot.slane %v3053_v40, %v3061_v31 }
 0xbeb   : > { %3510 = vmatpush1.bf16.msra.mxu0 %v4858_v18  ;;  %4353 = vmatpush3.bf16.msra.mxu1 %v4861_v20 }
 0xbee   : > { %3528 = vmatmul.mubr.bf16.vlgmr.msra.gmra.mrb[24].mxu0 %v2956_v22  ;;  %4355 = vmatmul.mubr.bf16.vlgmr.msra.gmra.mrb[64].mxu1 %v2956_v22 }
 0xca1   : > { %v4191_v23 = vpop.f32.mrb[60].mxu1 }
 0xca2   : > { %v4192_v24 = vpop.f32.mrb[61].mxu1 }
 0xca3   : > { %v4193_v2 = vadd.f32 %v4192_v24, %v4191_v23  ;;  %v4194_v27 = vpop.f32.mrb[62].mxu1 }
 0xca4   : > { %v4195_v28 = vpop.f32.mrb[63].mxu1 }
 0xca5   : > { %v3571_v53 = vadd.f32 %v4193_v2, %v3066_v25 }
 0xcc1   : > { %v3529_v35 = vpop.f32.mrb[24].mxu0  ;;  %v3610_v38 = vpop.f32.mrb[64].mxu1 }
 0xcc2   : > { %v4358_v39 = vadd.f32 %v3529_v35, %v3058_v33  ;;  %v3611_v41 = vadd.f32 %v3610_v38, %v3571_v53  ;;  %v3531_v42 = vpop.f32.mrb[25].mxu0  ;;  %v4356_v43 = vpop.f32.mrb[65].mxu1 }
 0xcc3   : > { %v4359_v19 = vadd.f32 %v3531_v42, %v3062_v37  ;;  %v3533_v44 = vpop.f32.mrb[26].mxu0  ;;  %v3613_v45 = vpop.f32.mrb[66].mxu1 }
 0xcc4   : > { %3616 = vst [vmem:[%s325_s13] sm:$0xff] %v4358_v39  ;;  %3618 = vst [vmem:[%s325_s13 + $0x10] sm:$0xff] %v3611_v41  ;;  %v3534_v30 = vpop.f32.mrb[27].mxu0  ;;  %v4357_v46 = vpop.f32.mrb[67].mxu1 }
 0xcc5   : > { %3617 = vst [vmem:[%s325_s13 + $0x8] sm:$0xff] %v4359_v19 }
 0xcc6   : > { %5041 = shalt.err (!%p5038_p0)
}
 0xcc7   : > { %s5042_s7 = scalar_lea.hbm %s5620_s25, 384  ;;  %s5046_s18 = scalar_lea.hbm %s5670_s6, 768 }
 0xcc8   : > { %p5043_p2 = scmp.ne.s32.totalorder %s5620_s25, %s5042_s7  ;;  %p5047_p10 = scmp.lt.u32.totalorder %s5620_s25, %s5670_s6 }
 0xcc9   : > { %p5048_p11 = scmp.lt.u32.totalorder %s5046_s18, %s5042_s7  ;;  %p5050_p5 = scmp.lt.u32.totalorder %s5042_s7, %s5620_s25 }
 0xcca   : > { %p5044_p8 = pnand %p5043_p2, %p5689_p6 }
 0xccb   : > { %p5049_p1 = por %p5048_p11, %p5047_p10 }
 0xccc   : > { %p5045_p4 = pneg %p5044_p8 }
 0xccd   : > { %p5051_p7 = por %p5050_p5, %p5049_p1 }
 0xccf   : > { %p5052_p9 = pnand %p5051_p7, %p5045_p4 }
 0xcd1   : > { %5055 = shalt.err (!%p5052_p9)
}
 0xcd2   : > { %4398 = dma.vmem_to_hbm [thread:$0]  (%p5689_p6), %s5622_s30, 384, %s5620_s25, %s3620_s27  }
 0xcd3 PF: > { %s3646_s13 = sand.u32 1, %s5090_s21   ;;  %p5690_p12 = scmp.ne.s32.totalorder %s5680_s17, 0 }
 0xcd4   : > { %p5691_p3 = scmp.ge.s32.totalorder %s5102_s24, 2  ;;  %s3647_s11 = scalar_lea.sflag [#allocation4], %s3646_s13 }
 0xcd6   : > { %p4418_p13 = pnand %p5691_p3, %p5690_p12 }
 0xcd8   : > { %5085 = dma.done.wait (!%p4418_p13), %s3647_s11, 384  }
 0xcd9   : > { %5087 = vsyncadd (!%p4418_p13), %s3647_s11, 4294966912  ;;  %p21_p0 = scmp.ge.s32.totalorder %s5303_s15, 4   ;;  %s5692_s21 = smov %s5094_s22 }
 0xcda   : > { %s5693_s22 = smov %s5098_s23  ;;  %s5694_s23 = smov %s5314_s26 }
 0xcdb   : > { %s5695_s24 = smov %s5303_s15  ;;  %23 = sbr.rel (!%p21_p0) target bundleno = 7 (0x7), region = 105 }
 0xce2   :  { %3652 = vsyncpa [#allocation3], 1 }
 0xce3   :  { %3654 = vsyncpa [#allocation3 + $0x1], 1 }
 0xce4   :  { %3655 = vsyncpa [#allocation6], 1 }
 0xce5   :  { %3656 = vsyncpa [#allocation9], 1 }
 0xce6   :  { %3657 = vsyncpa [#allocation4], 1 }
 0xce7   :  { %3659 = vsyncpa [#allocation4 + $0x1], 1 }

</bundles_post_ra>
